<compile_context>
chip_gen: v7x
topology: tpu7x:2x2x1
jax: 0.10.0
libtpu: 0.0.40
codegen_flags: <defaults>
</compile_context>

<pallas_src>
import functools

import jax
import jax.numpy as jnp
from jax import lax
from jax.experimental import pallas as pl
from jax.experimental.pallas import tpu as pltpu


def _round_up(n, m):
    return (n + m - 1) // m * m


def _apply_activation(x, activation):
    if activation == "relu":
        return jnp.maximum(x, 0.0)
    if activation == "sigmoid":
        return jax.nn.sigmoid(x)
    if activation == "tanh":
        return jnp.tanh(x)
    raise ValueError(f"Undefined activation function: {activation}")


def _conv_maxpool_kernel(x_ref, w_ref, vlen_ref, o_ref, xpad_ref, *,
                         front, max_pad, l_out_pad, head_rows, activation):
    """One batch tile per grid step.

    x_ref    : (TB, C_in, L, E)            f32   raw input block (native layout)
    w_ref    : (max_ks, C_in, E, oc_pad)   bf16  fused per-tap weights (all branches)
    vlen_ref : (1, oc_pad)                 i32   valid conv length per output column
    o_ref    : (TB, oc_pad)                f32   concatenated, lane-dense output slab
    xpad_ref : (TB, C_in, L_total, E)      bf16  VMEM scratch: zero-padded input slab
    """
    tb, c_in, seq_len, emb = x_ref.shape
    max_ks = w_ref.shape[0]
    oc_pad = w_ref.shape[-1]
    l_total = xpad_ref.shape[2]

    # ---- 1. synthesize the zero-padded bf16 slab in VMEM (no HBM pre-pass) ----
    # Pad rows are rewritten every step (cheap: a handful of rows), so there is
    # no reliance on a program_id==0 init -> safe under megacore sharding.
    if front > 0:
        xpad_ref[:, :, :front, :] = jnp.zeros((tb, c_in, front, emb), jnp.bfloat16)
    back = l_total - front - seq_len
    if back > 0:
        xpad_ref[:, :, front + seq_len:, :] = jnp.zeros(
            (tb, c_in, back, emb), jnp.bfloat16)
    xpad_ref[:, :, front:front + seq_len, :] = x_ref[...].astype(jnp.bfloat16)

    # ---- 2. fused conv: one lane-dense MXU matmul per (tap, in-channel) -------
    acc = None
    for dk in range(max_ks):
        ts = front - max_pad + dk                     # static, >= 0
        for c in range(c_in):
            lhs = xpad_ref[:, c:c + 1, ts:ts + l_out_pad, :]
            lhs = lhs.reshape(tb * l_out_pad, emb)    # (TB*l_out_pad, E) bf16
            part = jnp.dot(lhs, w_ref[dk, c],
                           preferred_element_type=jnp.float32)
            acc = part if acc is None else acc + part
    acc = acc.reshape(tb, l_out_pad, oc_pad)          # f32 conv outputs, all branches

    # ---- 3. length-max first (branch-validity mask on tail rows only),
    #         then the (monotonic) activation on the (TB, oc_pad) maxima --------
    neg = jnp.finfo(jnp.float32).min
    tail_rows = l_out_pad - head_rows
    if tail_rows > 0:
        row = head_rows + lax.broadcasted_iota(jnp.int32, (tail_rows, 1), 0)
        mask = row < vlen_ref[...]                    # (tail_rows, oc_pad)
        tail = jnp.where(mask[None, :, :], acc[:, head_rows:, :], neg)
        m = jnp.max(tail, axis=1)
        if head_rows > 0:
            m = jnp.maximum(m, jnp.max(acc[:, :head_rows, :], axis=1))
    else:
        m = jnp.max(acc, axis=1)

    o_ref[...] = _apply_activation(m, activation).astype(o_ref.dtype)


def conv_maxpool_forward(x, weights, kernel_sizes, activation="relu"):
    """Pallas implementation of ConvMaxpool.forward.

    x:       (B, C_in, L, E) float32 (NCHW, as fed to nn.Conv2d)
    weights: list of (oc_i, C_in, ks_i, E) conv kernels (bias=None)
    returns: (B, sum(oc_i)) float32
    """
    B, C_in, L, E = x.shape
    n_branch = len(kernel_sizes)
    assert len(weights) == n_branch
    # PyTorch uses padding = ks - 2; ks == 1 would require a negative pad.
    assert all(ks >= 2 for ks in kernel_sizes), "kernel sizes must be >= 2"
    ocs = [int(w.shape[0]) for w in weights]
    for w, ks, oc in zip(weights, kernel_sizes, ocs):
        assert tuple(w.shape) == (oc, C_in, ks, E), (w.shape, (oc, C_in, ks, E))

    max_ks = max(kernel_sizes)
    max_pad = max_ks - 2
    oc_total = sum(ocs)
    oc_pad = _round_up(oc_total, 128)                 # lane-dense output width

    l_outs = [L + ks - 3 for ks in kernel_sizes]      # = L + 2*(ks-2) - ks + 1
    assert min(l_outs) >= 1, "sequence too short for the given kernel sizes"
    l_out_max = max(l_outs)
    l_out_pad = _round_up(l_out_max, 8)
    head_rows = (min(l_outs) // 8) * 8                # rows valid for every branch

    front = _round_up(max_pad, 8)                     # aligned front pad in the slab
    l_total = _round_up(
        max(front + L, front - max_pad + (max_ks - 1) + l_out_pad), 8)

    # ---- fused weight: (max_ks, C_in, E, oc_pad) ----------------------------
    # Branch with kernel ks sits at global taps [max_ks - ks, max_ks) and in its
    # own output-column slice; everything else is zero.
    w_fused = jnp.zeros((max_ks, C_in, E, oc_pad), jnp.float32)
    col = 0
    for w, ks, oc in zip(weights, kernel_sizes, ocs):
        wt = jnp.transpose(w.astype(jnp.float32), (2, 1, 3, 0))   # (ks, C_in, E, oc)
        start = max_ks - ks
        w_fused = w_fused.at[start:start + ks, :, :, col:col + oc].set(wt)
        col += oc
    w_fused = w_fused.astype(jnp.bfloat16)

    # Per-output-column valid conv length (padded columns get l_out_max; they
    # carry zero weights and are sliced off anyway).
    vparts = [jnp.full((oc,), lo, jnp.int32) for oc, lo in zip(ocs, l_outs)]
    vparts.append(jnp.full((oc_pad - oc_total,), l_out_max, jnp.int32))
    valid_len = jnp.concatenate(vparts).reshape(1, oc_pad)

    # ---- generation-aware batch tile (v5e/v6e: 128 MiB VMEM, v7x: 64 MiB) ----
    vmem_cap = 64 * 1024 * 1024                       # conservative fallback
    try:
        cap = getattr(pltpu.get_tpu_info(), "vmem_capacity_bytes", None)
        if cap:
            vmem_cap = int(cap)
    except Exception:
        pass
    budget = int(0.55 * vmem_cap)

    lane_e = _round_up(E, 128)

    def est_bytes(tb):
        x_block = 2 * tb * C_in * _round_up(L, 8) * lane_e * 4       # f32, dbl-buffered
        slab = tb * C_in * _round_up(l_total, 16) * lane_e * 2       # bf16 scratch
        # weights counted 2x (conservative: default double-buffering of the
        # constant-index weight block; pl.Buffered(1) would halve this).
        w_bytes = 2 * max_ks * C_in * _round_up(E, 16) * oc_pad * 2
        out_block = 2 * tb * oc_pad * 4
        acc = tb * l_out_pad * oc_pad * 4
        lhs = tb * l_out_pad * lane_e * 2
        return x_block + slab + w_bytes + out_block + 3 * acc + 3 * lhs + (2 << 20)

    TB = 8
    b_cap = _round_up(B, 8)
    while TB * 2 <= b_cap and est_bytes(TB * 2) <= budget:
        TB *= 2
    # Keep >= 2 grid steps when possible so v7x's two TensorCores both get work.
    while TB > 8 and (B + TB - 1) // TB < 2:
        TB //= 2

    n_steps = (B + TB - 1) // TB
    B_out = n_steps * TB
    # Only copy x when the batch is ragged w.r.t. the tile; in the common
    # (aligned) case x is read straight from HBM with no host pre-pass.
    x_in = x if B_out == B else jnp.pad(
        x, ((0, B_out - B), (0, 0), (0, 0), (0, 0)))

    est = est_bytes(TB)
    vmem_limit = int(min(max(2 * est, 32 * 1024 * 1024), 0.9 * vmem_cap))

    kernel = functools.partial(
        _conv_maxpool_kernel,
        front=front,
        max_pad=max_pad,
        l_out_pad=l_out_pad,
        head_rows=head_rows,
        activation=activation,
    )

    out = pl.pallas_call(
        kernel,
        out_shape=jax.ShapeDtypeStruct((B_out, oc_pad), jnp.float32),
        grid=(n_steps,),
        in_specs=[
            pl.BlockSpec((TB, C_in, L, E), lambda b: (b, 0, 0, 0)),
            pl.BlockSpec((max_ks, C_in, E, oc_pad), lambda b: (0, 0, 0, 0)),
            pl.BlockSpec((1, oc_pad), lambda b: (0, 0)),
        ],
        out_specs=pl.BlockSpec((TB, oc_pad), lambda b: (b, 0)),
        scratch_shapes=[pltpu.VMEM((TB, C_in, l_total, E), jnp.bfloat16)],
        compiler_params=pltpu.CompilerParams(
            dimension_semantics=("parallel",),
            vmem_limit_bytes=vmem_limit,
        ),
    )(x_in, w_fused, valid_len)

    # TODO(synk): very long L*E (input block > VMEM budget at TB=8) would need an
    # additional length-tiled grid axis with a cross-step running max.
    return out[:B, :oc_total]


def _reference_forward(x, weights, kernel_sizes, activation="relu"):
    """Pure-JAX reference (bf16 inputs, f32 accumulation — matches kernel numerics)."""
    xb = x.astype(jnp.bfloat16)
    outs = []
    for w, ks in zip(weights, kernel_sizes):
        y = lax.conv_general_dilated(
            xb, w.astype(jnp.bfloat16),
            window_strides=(1, 1),
            padding=((ks - 2, ks - 2), (0, 0)),
            dimension_numbers=("NCHW", "OIHW", "NCHW"),
            preferred_element_type=jnp.float32,
        )                                         # (B, oc, L_out, 1)
        y = _apply_activation(y, activation)
        y = jnp.squeeze(y, axis=3)                # (B, oc, L_out)
        outs.append(jnp.max(y, axis=2))           # (B, oc)
    return jnp.concatenate(outs, axis=-1)


if __name__ == "__main__":
    configs = [
        dict(B=2, C_in=1, L=16, E=32, out_channels=[8, 8],
             kernel_sizes=[3, 4], activation="relu"),
        dict(B=3, C_in=2, L=9, E=24, out_channels=[5, 7, 6],
             kernel_sizes=[2, 3, 5], activation="tanh"),
    ]

    key = jax.random.PRNGKey(0)
    for cfg in configs:
        B, C_in, L, E = cfg["B"], cfg["C_in"], cfg["L"], cfg["E"]
        ocs, kss, act = cfg["out_channels"], cfg["kernel_sizes"], cfg["activation"]

        key, kx = jax.random.split(key)
        x = jax.random.normal(kx, (B, C_in, L, E), dtype=jnp.float32)
        weights = []
        for oc, ks in zip(ocs, kss):
            key, kw = jax.random.split(key)
            weights.append(
                0.1 * jax.random.normal(kw, (oc, C_in, ks, E), dtype=jnp.float32))

        out = jax.block_until_ready(
            conv_maxpool_forward(x, weights, kss, activation=act))
        ref = jax.block_until_ready(
            _reference_forward(x, weights, kss, activation=act))

        assert out.shape == (B, sum(ocs)), out.shape
        err = float(jnp.max(jnp.abs(out - ref)))
        assert jnp.allclose(out, ref, atol=3e-3, rtol=3e-3), \
            f"mismatch vs reference (cfg={cfg}): max abs err {err}"

    print("KERNEL_OK")
</pallas_src>

<mosaic_0001>
module attributes {stable_mosaic.version = 11 : i64} {
  func.func @_conv_maxpool_kernel(%arg0: i32, %arg1: memref<8x1x16x32xf32, #tpu.memory_space<vmem>>, %arg2: memref<4x1x32x128xbf16, #tpu.memory_space<vmem>>, %arg3: memref<1x128xi32, #tpu.memory_space<vmem>>, %arg4: memref<8x128xf32, #tpu.memory_space<vmem>>, %arg5: memref<8x1x40x32xbf16, #tpu.memory_space<vmem>>) attributes {dimension_semantics = [#tpu.dimension_semantics<parallel>], iteration_bounds = array<i64: 1>, scalar_prefetch = 0 : i64, scratch_operands = 1 : i64, tpu.core_type = #tpu.core_type<tc>, window_params = [{transform_indices = @transform_0, window_bounds = array<i64: 8, 1, 16, 32>}, {pipeline_mode = #tpu.pipeline_mode<synchronous>, transform_indices = @transform_1, window_bounds = array<i64: 4, 1, 32, 128>}, {pipeline_mode = #tpu.pipeline_mode<synchronous>, transform_indices = @transform_2, window_bounds = array<i64: 1, 128>}, {transform_indices = @transform_3, window_bounds = array<i64: 8, 128>}]} {
    %cst = arith.constant 0.000000e+00 : bf16
    %0 = vector.broadcast %cst : bf16 to vector<8x1x8x32xbf16>
    %c0 = arith.constant 0 : index
    %c0_0 = arith.constant 0 : index
    %c0_1 = arith.constant 0 : index
    %c0_2 = arith.constant 0 : index
    %1 = vector.load %arg5[%c0, %c0_0, %c0_1, %c0_2] : memref<8x1x40x32xbf16, #tpu.memory_space<vmem>>, vector<8x1x8x32xbf16>
    tpu.vector_store %arg5[%c0, %c0_0, %c0_1, %c0_2], %0 {strides = array<i32>} : memref<8x1x40x32xbf16, #tpu.memory_space<vmem>>, vector<8x1x8x32xbf16>,
    %cst_3 = arith.constant 0.000000e+00 : bf16
    %2 = vector.broadcast %cst_3 : bf16 to vector<8x1x16x32xbf16>
    %c0_4 = arith.constant 0 : index
    %c0_5 = arith.constant 0 : index
    %c24 = arith.constant 24 : index
    %c0_6 = arith.constant 0 : index
    %3 = vector.load %arg5[%c0_4, %c0_5, %c24, %c0_6] : memref<8x1x40x32xbf16, #tpu.memory_space<vmem>>, vector<8x1x16x32xbf16>
    tpu.vector_store %arg5[%c0_4, %c0_5, %c24, %c0_6], %2 {strides = array<i32>} : memref<8x1x40x32xbf16, #tpu.memory_space<vmem>>, vector<8x1x16x32xbf16>,
    %c0_7 = arith.constant 0 : index
    %c0_8 = arith.constant 0 : index
    %c0_9 = arith.constant 0 : index
    %c0_10 = arith.constant 0 : index
    %4 = vector.load %arg1[%c0_7, %c0_8, %c0_9, %c0_10] : memref<8x1x16x32xf32, #tpu.memory_space<vmem>>, vector<8x1x16x32xf32>
    %5 = arith.truncf %4 : vector<8x1x16x32xf32> to vector<8x1x16x32xbf16>
    %c0_11 = arith.constant 0 : index
    %c0_12 = arith.constant 0 : index
    %c8 = arith.constant 8 : index
    %c0_13 = arith.constant 0 : index
    %6 = vector.load %arg5[%c0_11, %c0_12, %c8, %c0_13] : memref<8x1x40x32xbf16, #tpu.memory_space<vmem>>, vector<8x1x16x32xbf16>
    tpu.vector_store %arg5[%c0_11, %c0_12, %c8, %c0_13], %5 {strides = array<i32>} : memref<8x1x40x32xbf16, #tpu.memory_space<vmem>>, vector<8x1x16x32xbf16>,
    %c0_14 = arith.constant 0 : index
    %c0_15 = arith.constant 0 : index
    %c6 = arith.constant 6 : index
    %c0_16 = arith.constant 0 : index
    %7 = vector.load %arg5[%c0_14, %c0_15, %c6, %c0_16] : memref<8x1x40x32xbf16, #tpu.memory_space<vmem>>, vector<8x1x24x32xbf16>
    %8 = vector.shape_cast %7 : vector<8x1x24x32xbf16> to vector<192x32xbf16>
    %c0_17 = arith.constant 0 : index
    %c0_18 = arith.constant 0 : index
    %c0_19 = arith.constant 0 : index
    %c0_20 = arith.constant 0 : index
    %9 = vector.load %arg2[%c0_17, %c0_18, %c0_19, %c0_20] : memref<4x1x32x128xbf16, #tpu.memory_space<vmem>>, vector<1x1x32x128xbf16>
    %10 = vector.shape_cast %9 : vector<1x1x32x128xbf16> to vector<32x128xbf16>
    %cst_21 = arith.constant dense<0.000000e+00> : vector<192x128xf32>
    %11 = tpu.matmul %8, %10, %cst_21 {dimension_numbers = #tpu.dot_dimension_numbers<[1], [0], [0], [1], [0, 0, 1, 1], [], []>} : vector<192x32xbf16>, vector<32x128xbf16>, vector<192x128xf32> -> vector<192x128xf32>
    %c0_22 = arith.constant 0 : index
    %c0_23 = arith.constant 0 : index
    %c7 = arith.constant 7 : index
    %c0_24 = arith.constant 0 : index
    %12 = vector.load %arg5[%c0_22, %c0_23, %c7, %c0_24] : memref<8x1x40x32xbf16, #tpu.memory_space<vmem>>, vector<8x1x24x32xbf16>
    %13 = vector.shape_cast %12 : vector<8x1x24x32xbf16> to vector<192x32xbf16>
    %c1 = arith.constant 1 : index
    %c0_25 = arith.constant 0 : index
    %c0_26 = arith.constant 0 : index
    %c0_27 = arith.constant 0 : index
    %14 = vector.load %arg2[%c1, %c0_25, %c0_26, %c0_27] : memref<4x1x32x128xbf16, #tpu.memory_space<vmem>>, vector<1x1x32x128xbf16>
    %15 = vector.shape_cast %14 : vector<1x1x32x128xbf16> to vector<32x128xbf16>
    %cst_28 = arith.constant dense<0.000000e+00> : vector<192x128xf32>
    %16 = tpu.matmul %13, %15, %cst_28 {dimension_numbers = #tpu.dot_dimension_numbers<[1], [0], [0], [1], [0, 0, 1, 1], [], []>} : vector<192x32xbf16>, vector<32x128xbf16>, vector<192x128xf32> -> vector<192x128xf32>
    %17 = arith.addf %11, %16 : vector<192x128xf32>
    %c0_29 = arith.constant 0 : index
    %c0_30 = arith.constant 0 : index
    %c8_31 = arith.constant 8 : index
    %c0_32 = arith.constant 0 : index
    %18 = vector.load %arg5[%c0_29, %c0_30, %c8_31, %c0_32] : memref<8x1x40x32xbf16, #tpu.memory_space<vmem>>, vector<8x1x24x32xbf16>
    %19 = vector.shape_cast %18 : vector<8x1x24x32xbf16> to vector<192x32xbf16>
    %c2 = arith.constant 2 : index
    %c0_33 = arith.constant 0 : index
    %c0_34 = arith.constant 0 : index
    %c0_35 = arith.constant 0 : index
    %20 = vector.load %arg2[%c2, %c0_33, %c0_34, %c0_35] : memref<4x1x32x128xbf16, #tpu.memory_space<vmem>>, vector<1x1x32x128xbf16>
    %21 = vector.shape_cast %20 : vector<1x1x32x128xbf16> to vector<32x128xbf16>
    %cst_36 = arith.constant dense<0.000000e+00> : vector<192x128xf32>
    %22 = tpu.matmul %19, %21, %cst_36 {dimension_numbers = #tpu.dot_dimension_numbers<[1], [0], [0], [1], [0, 0, 1, 1], [], []>} : vector<192x32xbf16>, vector<32x128xbf16>, vector<192x128xf32> -> vector<192x128xf32>
    %23 = arith.addf %17, %22 : vector<192x128xf32>
    %c0_37 = arith.constant 0 : index
    %c0_38 = arith.constant 0 : index
    %c9 = arith.constant 9 : index
    %c0_39 = arith.constant 0 : index
    %24 = vector.load %arg5[%c0_37, %c0_38, %c9, %c0_39] : memref<8x1x40x32xbf16, #tpu.memory_space<vmem>>, vector<8x1x24x32xbf16>
    %25 = vector.shape_cast %24 : vector<8x1x24x32xbf16> to vector<192x32xbf16>
    %c3 = arith.constant 3 : index
    %c0_40 = arith.constant 0 : index
    %c0_41 = arith.constant 0 : index
    %c0_42 = arith.constant 0 : index
    %26 = vector.load %arg2[%c3, %c0_40, %c0_41, %c0_42] : memref<4x1x32x128xbf16, #tpu.memory_space<vmem>>, vector<1x1x32x128xbf16>
    %27 = vector.shape_cast %26 : vector<1x1x32x128xbf16> to vector<32x128xbf16>
    %cst_43 = arith.constant dense<0.000000e+00> : vector<192x128xf32>
    %28 = tpu.matmul %25, %27, %cst_43 {dimension_numbers = #tpu.dot_dimension_numbers<[1], [0], [0], [1], [0, 0, 1, 1], [], []>} : vector<192x32xbf16>, vector<32x128xbf16>, vector<192x128xf32> -> vector<192x128xf32>
    %29 = arith.addf %23, %28 : vector<192x128xf32>
    %30 = vector.shape_cast %29 : vector<192x128xf32> to vector<8x24x128xf32>
    %31 = tpu.iota {dimensions = array<i32: 0>} : vector<8x1xi32>
    %c16_i32 = arith.constant 16 : i32
    %32 = vector.broadcast %c16_i32 : i32 to vector<8x1xi32>
    %33 = arith.addi %32, %31 : vector<8x1xi32>
    %c0_44 = arith.constant 0 : index
    %c0_45 = arith.constant 0 : index
    %34 = vector.load %arg3[%c0_44, %c0_45] : memref<1x128xi32, #tpu.memory_space<vmem>>, vector<1x128xi32>
    %35 = vector.broadcast %33 : vector<8x1xi32> to vector<8x128xi32>
    %36 = vector.broadcast %34 : vector<1x128xi32> to vector<8x128xi32>
    %37 = arith.cmpi slt, %35, %36 : vector<8x128xi32>
    %38 = vector.shape_cast %37 : vector<8x128xi1> to vector<1x8x128xi1>
    %39 = vector.extract_strided_slice %30 {offsets = [0, 16, 0], sizes = [8, 8, 128], strides = [1, 1, 1]} : vector<8x24x128xf32> to vector<8x8x128xf32>
    %cst_46 = arith.constant -3.40282347E+38 : f32
    %40 = vector.shape_cast %38 : vector<1x8x128xi1> to vector<1x8x128xi1>
    %41 = vector.broadcast %40 : vector<1x8x128xi1> to vector<8x8x128xi1>
    %42 = vector.broadcast %cst_46 : f32 to vector<8x8x128xf32>
    %43 = arith.select %41, %39, %42 : vector<8x8x128xi1>, vector<8x8x128xf32>
    %cst_47 = arith.constant dense<0xFF800000> : vector<8x128xf32>
    %44 = vector.multi_reduction <maximumf>, %43, %cst_47 [1] : vector<8x8x128xf32> to vector<8x128xf32>
    %45 = vector.extract_strided_slice %30 {offsets = [0, 0, 0], sizes = [8, 16, 128], strides = [1, 1, 1]} : vector<8x24x128xf32> to vector<8x16x128xf32>
    %cst_48 = arith.constant dense<0xFF800000> : vector<8x128xf32>
    %46 = vector.multi_reduction <maximumf>, %45, %cst_48 [1] : vector<8x16x128xf32> to vector<8x128xf32>
    %47 = arith.maximumf %44, %46 : vector<8x128xf32>
    %cst_49 = arith.constant 0.000000e+00 : f32
    %48 = vector.broadcast %cst_49 : f32 to vector<8x128xf32>
    %49 = arith.maximumf %47, %48 : vector<8x128xf32>
    %c0_50 = arith.constant 0 : index
    %c0_51 = arith.constant 0 : index
    %50 = vector.load %arg4[%c0_50, %c0_51] : memref<8x128xf32, #tpu.memory_space<vmem>>, vector<8x128xf32>
    tpu.vector_store %arg4[%c0_50, %c0_51], %49 {strides = array<i32>} : memref<8x128xf32, #tpu.memory_space<vmem>>, vector<8x128xf32>,
    return
  }
  func.func @transform_0(%arg0: i32) -> (i32, i32, i32, i32) {
    %c0_i32 = arith.constant 0 : i32
    %c0_i32_0 = arith.constant 0 : i32
    %c0_i32_1 = arith.constant 0 : i32
    %c0_i32_2 = arith.constant 0 : i32
    return %arg0, %c0_i32, %c0_i32_0, %c0_i32_1 : i32, i32, i32, i32
  }
  func.func @transform_1(%arg0: i32) -> (i32, i32, i32, i32) {
    %c0_i32 = arith.constant 0 : i32
    %c0_i32_0 = arith.constant 0 : i32
    %c0_i32_1 = arith.constant 0 : i32
    %c0_i32_2 = arith.constant 0 : i32
    %c0_i32_3 = arith.constant 0 : i32
    return %c0_i32, %c0_i32_0, %c0_i32_1, %c0_i32_2 : i32, i32, i32, i32
  }
  func.func @transform_2(%arg0: i32) -> (i32, i32) {
    %c0_i32 = arith.constant 0 : i32
    %c0_i32_0 = arith.constant 0 : i32
    %c0_i32_1 = arith.constant 0 : i32
    return %c0_i32, %c0_i32_0 : i32, i32
  }
  func.func @transform_3(%arg0: i32) -> (i32, i32) {
    %c0_i32 = arith.constant 0 : i32
    %c0_i32_0 = arith.constant 0 : i32
    return %arg0, %c0_i32 : i32, i32
  }
}

</mosaic_0001>

<bundles_post_ra>
// kernel: tpu_custom_call.1
= control target key start
LH: loop header
LB: loop body
LE: loop exit
PB: predicated region body
PF: predicated region fallthrough
CT: control target
= control target key end

     0   :  { %8 = vsyncpa [#allocation4], 0  ;;  %s3073_s0 = inlined_call_operand.hbm [shape: f32[8,1,16,32], index: 0, kind: input, shape index: {}]   ;;  %s3074_s1 = inlined_call_operand.hbm [shape: bf16[4,1,32,128], index: 1, kind: input, shape index: {}]   ;;  %s3075_s2 = inlined_call_operand.vmem [shape: s32[1,128], index: 2, kind: input, shape index: {}]   ;;  %s3076_s3 = inlined_call_operand.hbm [shape: f32[8,128], index: 3, kind: output, shape index: {}]  }
   0x1   :  { %9 = vsyncpa [#allocation7], 0 }
   0x2   :  { %10 = vsyncpa [#allocation5], 0  ;;  %s2478_s12 = smov [#allocation3]   ;;  %s2406_s16 = scalar_lea.hbm %s3073_s0, 2048 }
   0x3   :  { %s16_s13 = sshll.u32 %s2478_s12, 4  ;;  %p2407_p0 = scmp.ne.s32.totalorder %s3073_s0, %s2406_s16  ;;  %s17_s13 = int_to_ptr.vmem [resolvable:$true] %s16_s13 }
   0x4   :  { %p2410_p1 = scmp.lt.u32.totalorder %s2406_s16, %s3073_s0 }
   0x6   :  { %p2412_p2 = pnand %p2410_p1, %p2407_p0 }
   0x8   :  { %2415 = shalt.err (!%p2412_p2)
}
   0x9   :  { %s2416_s21 = scalar_lea.vmem %s17_s13, 2048  ;;  %p2421_p4 = scmp.lt.s32.totalorder %s17_s13, %s17_s13 }
   0xa   :  { %p2417_p3 = scmp.ne.s32.totalorder %s17_s13, %s2416_s21  ;;  %p2422_p5 = scmp.lt.s32.totalorder %s2416_s21, %s2416_s21 }
   0xc   :  { %p2423_p6 = por %p2422_p5, %p2421_p4 }
   0xe   :  { %p2424_p7 = pnand %p2423_p6, %p2417_p3 }
  0x10   :  { %2427 = shalt.err (!%p2424_p7)
}
  0x11   :  { %s2479_s22 = smov 128   ;;  %s2480_s23 = smov 8  }
  0x12   :  { %22 = dma.hbm_to_vmem [thread:$0]  %s3073_s0, 2048, %s17_s13, [#allocation4], %s2479_s22, %s2479_s22, %s2480_s23  }
  0x13   :  { %s2481_s26 = smov [#allocation6]   ;;  %s2428_s30 = scalar_lea.hbm %s3074_s1, 1024 }
  0x14   :  { %s28_s27 = sshll.u32 %s2481_s26, 4  ;;  %p2429_p8 = scmp.ne.s32.totalorder %s3074_s1, %s2428_s30  ;;  %s29_s27 = int_to_ptr.vmem [resolvable:$true] %s28_s27 }
  0x15   :  { %p2432_p9 = scmp.lt.u32.totalorder %s2428_s30, %s3074_s1 }
  0x17   :  { %p2434_p10 = pnand %p2432_p9, %p2429_p8 }
  0x19   :  { %2437 = shalt.err (!%p2434_p10)
}
  0x1a   :  { %s2438_s8 = scalar_lea.vmem %s29_s27, 1024  ;;  %p2443_p12 = scmp.lt.s32.totalorder %s29_s27, %s29_s27 }
  0x1b   :  { %p2439_p11 = scmp.ne.s32.totalorder %s29_s27, %s2438_s8  ;;  %p2444_p13 = scmp.lt.s32.totalorder %s2438_s8, %s2438_s8 }
  0x1d   :  { %p2445_p0 = por %p2444_p13, %p2443_p12 }
  0x1f   :  { %p2446_p1 = pnand %p2445_p0, %p2439_p11 }
  0x21   :  { %2449 = shalt.err (!%p2446_p1)
}
  0x22   :  { %s2482_s0 = smov 64   ;;  %s2483_s9 = smov 4  }
  0x23   :  { %34 = dma.hbm_to_vmem [thread:$0]  %s3074_s1, 1024, %s29_s27, [#allocation7], %s2482_s0, %s2482_s0, %s2483_s9  }
  0x24   :  { %2472 = dma.done.wait [#allocation4], 2048  }
  0x25   :  { %2473 = vsyncadd [#allocation4], 4294965248 }
  0x26   :  { %2474 = dma.done.wait [#allocation7], 1024  }
  0x27   :  { %2475 = vsyncadd [#allocation7], 4294966272  ;;  %vm44_vm0 = vcmask 257024   ;;  %v2484_v0 = vmov 0   ;;  %v2386_v1 = vld [vmem:[#allocation6 + $0x20] sm:$0xff]   ;;  %v2387_v2 = vld [vmem:[#allocation6 + $0x28] sm:$0xff]  }
  0x28   :  { %53 = vst.msk [vmem:[#allocation2 + $0xc] sm:$0xf] %vm44_vm0, %v2484_v0  ;;  %45 = vst.msk [vmem:[#allocation2] sm:$0xf] %vm44_vm0, %v2484_v0  ;;  %2250 = vmatprep.subr.bf16.mxu0 %v2386_v1  ;;  %v2388_v3 = vld [vmem:[#allocation6 + $0x10] sm:$0xff]   ;;  %v69_v4 = vld [vmem:[#allocation3] sm:$0xff] }
  0x29   :  { %46 = vst.msk [vmem:[#allocation2 + $0x14] sm:$0xf] %vm44_vm0, %v2484_v0  ;;  %47 = vst.msk [vmem:[#allocation2 + $0x28] sm:$0xf] %vm44_vm0, %v2484_v0  ;;  %2251 = vmatpush3.bf16.msra.mxu0 %v2386_v1  ;;  %v70_v5 = vld [vmem:[#allocation3 + $0x8] sm:$0xff]  ;;  %2194 = vmatprep.subr.bf16.mxu1 %v2388_v3  ;;  %v2122_v7 = vpack.c.bf16 %v69_v4, %v69_v4  ;;  %vm229_vm1 = vcmask 1040384  }
  0x2a   :  { %48 = vst.msk [vmem:[#allocation2 + $0x3c] sm:$0xf] %vm44_vm0, %v2484_v0  ;;  %49 = vst.msk [vmem:[#allocation2 + $0x50] sm:$0xf] %vm44_vm0, %v2484_v0  ;;  %2252 = vmatprep.subr.bf16.mxu0 %v2387_v2  ;;  %v2123_v8 = vpack.c.bf16 %v70_v5, %v70_v5  ;;  %vm230_vm2 = vcmask 1044484   ;;  %v71_v9 = vld [vmem:[#allocation3 + $0x10] sm:$0xff]  ;;  %2195 = vmatpush3.bf16.msra.mxu1 %v2388_v3 }
  0x2b   :  { %50 = vst.msk [vmem:[#allocation2 + $0x64] sm:$0xf] %vm44_vm0, %v2484_v0  ;;  %51 = vst.msk [vmem:[#allocation2 + $0x78] sm:$0xf] %vm44_vm0, %v2484_v0  ;;  %vm628_vm3 = vcmask 261120   ;;  %v2124_v11 = vpack.c.bf16 %v71_v9, %v71_v9  ;;  %v2391_v14 = vld [vmem:[#allocation6 + $0x18] sm:$0xff]  }
  0x2c   :  { %52 = vst.msk [vmem:[#allocation2 + $0x8c] sm:$0xf] %vm44_vm0, %v2484_v0  ;;  %54 = vst.msk [vmem:[#allocation2 + $0x10] sm:$0xf] %vm44_vm0, %v2484_v0  ;;  %v2560_v15 = vld [vmem:[#allocation6] sm:$0xff]   ;;  %2196 = vmatprep.subr.bf16.mxu1 %v2391_v14  ;;  %v2569_v20 = vld [vmem:[#allocation6 + $0x30] sm:$0xff]  }
  0x2d   :  { %55 = vst.msk [vmem:[#allocation2 + $0x20] sm:$0xf] %vm44_vm0, %v2484_v0  ;;  %56 = vst.msk [vmem:[#allocation2 + $0x24] sm:$0xf] %vm44_vm0, %v2484_v0  ;;  %vm324_vm4 = vsmask.f32 256  ;;  %2253 = vmatpush3.bf16.msra.mxu0 %v2387_v2 }
  0x2e   :  { %57 = vst.msk [vmem:[#allocation2 + $0x34] sm:$0xf] %vm44_vm0, %v2484_v0  ;;  %58 = vst.msk [vmem:[#allocation2 + $0x38] sm:$0xf] %vm44_vm0, %v2484_v0  ;;  %vm325_vm5 = vsmask.f32 4368  ;;  %2197 = vmatpush3.bf16.msra.mxu1 %v2391_v14  ;;  %2278 = vmatprep.subr.bf16.mxu0 %v2569_v20 }
  0x2f   :  { %59 = vst.msk [vmem:[#allocation2 + $0x48] sm:$0xf] %vm44_vm0, %v2484_v0  ;;  %60 = vst.msk [vmem:[#allocation2 + $0x4c] sm:$0xf] %vm44_vm0, %v2484_v0  ;;  %v2554_v6 = vld [vmem:[#allocation2 + $0xc] sm:$0x7]  ;;  %2222 = vmatprep.subr.bf16.mxu1 %v2560_v15 }
  0x30   :  { %61 = vst.msk [vmem:[#allocation2 + $0x5c] sm:$0xf] %vm44_vm0, %v2484_v0  ;;  %62 = vst.msk [vmem:[#allocation2 + $0x60] sm:$0xf] %vm44_vm0, %v2484_v0  ;;  %v2556_v10 = vld [vmem:[#allocation2 + $0xc] sm:$0xf] }
  0x31   :  { %63 = vst.msk [vmem:[#allocation2 + $0x70] sm:$0xf] %vm44_vm0, %v2484_v0  ;;  %64 = vst.msk [vmem:[#allocation2 + $0x74] sm:$0xf] %vm44_vm0, %v2484_v0  ;;  %v351_v12 = vshrl.u32 %v2556_v10, 16  ;;  %v354_v13 = vshll.u32 %v2556_v10, 16 }
  0x32   :  { %65 = vst.msk [vmem:[#allocation2 + $0x84] sm:$0xf] %vm44_vm0, %v2484_v0  ;;  %66 = vst.msk [vmem:[#allocation2 + $0x88] sm:$0xf] %vm44_vm0, %v2484_v0  ;;  %v2564_v16 = vld [vmem:[#allocation2] sm:$0x8] }
  0x33   :  { %67 = vst.msk [vmem:[#allocation2 + $0x98] sm:$0xf] %vm44_vm0, %v2484_v0  ;;  %68 = vst.msk [vmem:[#allocation2 + $0x9c] sm:$0xf] %vm44_vm0, %v2484_v0  ;;  %v240_v17 = vrot.slane %v2554_v6, 7  ;;  %v353_v18 = vrot.slane %v351_v12, 7 }
  0x34   :  { %149 = vst.msk [vmem:[#allocation2 + $0x4] sm:$0xf] %vm44_vm0, %v2122_v7  ;;  %150 = vst.msk [vmem:[#allocation2 + $0x8] sm:$0xf] %vm44_vm0, %v2123_v8  ;;  %v328_v19 = vshrl.u32 %v2564_v16, 16  ;;  %v72_v23 = vld [vmem:[#allocation3 + $0x18] sm:$0xff] }
  0x35   :  { %151 = vst.msk [vmem:[#allocation2 + $0x18] sm:$0xf] %vm44_vm0, %v2124_v11  ;;  %v2572_v22 = vld [vmem:[#allocation2 + $0x14] sm:$0x8]  ;;  %v2578_v26 = vor.u32 %v354_v13, %v353_v18  ;;  %v2581_v28 = vld [vmem:[#allocation2 + $0x20] sm:$0xf]  ;;  %v2125_v30 = vpack.c.bf16 %v72_v23, %v72_v23  ;;  %vm2618_vm6 = vmor %vm229_vm1, %vm230_vm2 }
  0x36   :  { %v2574_v24 = vrot.slane %v328_v19, 11  ;;  %v359_v27 = vshrl.u32 %v2572_v22, 16  ;;  %v73_v29 = vld [vmem:[#allocation3 + $0x20] sm:$0xff]  ;;  %v382_v31 = vshrl.u32 %v2581_v28, 16  ;;  %v385_v32 = vshll.u32 %v2581_v28, 16  ;;  %v74_v33 = vld [vmem:[#allocation3 + $0x28] sm:$0xff]  ;;  %vm2640_vm7 = vmor %vm324_vm4, %vm325_vm5 }
  0x37   :  { %v2126_v34 = vpack.c.bf16 %v73_v29, %v73_v29  ;;  %v2586_v35 = vld [vmem:[#allocation2 + $0x28] sm:$0x8]  ;;  %v75_v36 = vld [vmem:[#allocation3 + $0x30] sm:$0xff]  ;;  %v2127_v38 = vpack.c.bf16 %v74_v33, %v74_v33  ;;  %v76_v42 = vld [vmem:[#allocation3 + $0x38] sm:$0xff]  ;;  %152 = vst.msk [vmem:[#allocation2 + $0x1c] sm:$0xf] %vm44_vm0, %v2125_v30 }
  0x38   :  { %v2588_v37 = vrot.slane %v359_v27, 11  ;;  %v390_v39 = vshrl.u32 %v2586_v35, 16  ;;  %v2128_v40 = vpack.c.bf16 %v75_v36, %v75_v36  ;;  %v2591_v41 = vld [vmem:[#allocation2 + $0x34] sm:$0xf]  ;;  %v77_v43 = vld [vmem:[#allocation3 + $0x40] sm:$0xff]  ;;  %v384_v44 = vrot.slane %v382_v31, 7 }
  0x39   :  { %153 = vst.msk [vmem:[#allocation2 + $0x2c] sm:$0xf] %vm44_vm0, %v2126_v34  ;;  %v413_v45 = vshrl.u32 %v2591_v41, 16  ;;  %v416_v46 = vshll.u32 %v2591_v41, 16  ;;  %v2129_v47 = vpack.c.bf16 %v76_v42, %v76_v42  ;;  %v2597_v48 = vld [vmem:[#allocation2 + $0x48] sm:$0xf]  ;;  %v2130_v54 = vpack.c.bf16 %v77_v43, %v77_v43 }
  0x3a   :  { %v78_v49 = vld [vmem:[#allocation3 + $0x48] sm:$0xff]  ;;  %154 = vst.msk [vmem:[#allocation2 + $0x30] sm:$0xf] %vm44_vm0, %v2127_v38  ;;  %v2604_v52 = vrot.slane %v390_v39, 11  ;;  %155 = vst.msk [vmem:[#allocation2 + $0x40] sm:$0xf] %vm44_vm0, %v2128_v40  ;;  %v387_v12 = vor.u32 %v385_v32, %v384_v44 }
  0x3b   :  { %v2599_v50 = vld [vmem:[#allocation2 + $0x4] sm:$0xf]  ;;  %v2601_v51 = vld [vmem:[#allocation2 + $0x8] sm:$0xf]  ;;  %v444_v53 = vshrl.u32 %v2597_v48, 16  ;;  %v2131_v55 = vpack.c.bf16 %v78_v49, %v78_v49  ;;  %v79_v7 = vld [vmem:[#allocation3 + $0x50] sm:$0xff] }
  0x3c   :  { %v234_v56 = vrot.slane %v2599_v50, 7  ;;  %v3077_v57 = vrot.slane %v2601_v51, 7  ;;  %v2069_v58 = vcombine.low %v2599_v50, %v2601_v51  ;;  %v2612_v59 = vld [vmem:[#allocation2 + $0x18] sm:$0xf]  ;;  %v333_v60 = vshrl.u32 %v2599_v50, 16 }
  0x3d   :  { %156 = vst.msk [vmem:[#allocation2 + $0x44] sm:$0xf] %vm44_vm0, %v2129_v47  ;;  %v2070_v63 = vcombine.low %v2556_v10, %v2612_v59  ;;  %v336_v0 = vshll.u32 %v2599_v50, 16  ;;  %v342_v1 = vshrl.u32 %v2601_v51, 16  ;;  %157 = vst.msk [vmem:[#allocation2 + $0x54] sm:$0xf] %vm44_vm0, %v2130_v54  ;;  %v2132_v32 = vpack.c.bf16 %v79_v7, %v79_v7 }
  0x3e   :  { %158 = vst.msk [vmem:[#allocation2 + $0x58] sm:$0xf] %vm44_vm0, %v2131_v55  ;;  %v2631_v2 = vrot.slane %v234_v56, 4  ;;  %v239_v3 = vrot.slane %v3077_v57, 4  ;;  %2254 = vmatprep.mubr.msk.bf16.mxu0 %vm628_vm3, %v2069_v58  ;;  %v335_v4 = vrot.slane %v333_v60, 7  ;;  %v345_v5 = vshll.u32 %v2601_v51, 16 }
  0x3f   :  { %2255 = vmatmul.mubr.msk.bf16.vlgmr.msra.gmra.mrb[0].mxu0 %vm628_vm3, %v2070_v63  ;;  %v344_v9 = vrot.slane %v342_v1, 7  ;;  %v364_v10 = vshrl.u32 %v2612_v59, 16  ;;  %v367_v11 = vshll.u32 %v2612_v59, 16  ;;  %v2401_v13 = vld [vmem:[#allocation6 + $0x38] sm:$0xff]   ;;  %v415_v23 = vrot.slane %v413_v45, 7  ;;  %v2400_v1 = vld [vmem:[#allocation6 + $0x8] sm:$0xff]  }
  0x40   :  { %v2650_v14 = vsel %vm2618_vm6, %v239_v3, %v240_v17  ;;  %v338_v18 = vor.u32 %v336_v0, %v335_v4  ;;  %v340_v19 = vrot.slane %v335_v4, 4  ;;  %2279 = vmatpush3.bf16.msra.mxu0 %v2569_v20  ;;  %v2653_v31 = vld [vmem:[#allocation2 + $0x1c] sm:$0xf]  ;;  %v2655_v33 = vld [vmem:[#allocation2 + $0x2c] sm:$0xf]  ;;  %v446_v4 = vrot.slane %v444_v53, 7 }
  0x41   :  { %v347_v27 = vor.u32 %v345_v5, %v344_v9  ;;  %v349_v29 = vrot.slane %v344_v9, 4  ;;  %v366_v30 = vrot.slane %v364_v10, 7  ;;  %2280 = vmatprep.subr.bf16.mxu0 %v2401_v13  ;;  %v2071_v17 = vcombine.low %v2653_v31, %v2581_v28  ;;  %v2662_v34 = vld [vmem:[#allocation2 + $0x30] sm:$0xf]  ;;  %159 = vst.msk [vmem:[#allocation2 + $0x68] sm:$0xf] %vm44_vm0, %v2132_v32 }
  0x42   :  { %v339_v6 = vsel %vm2640_vm7, %v2574_v24, %v338_v18  ;;  %v373_v20 = vshrl.u32 %v2653_v31, 16  ;;  %v376_v36 = vshll.u32 %v2653_v31, 16  ;;  %v2072_v24 = vcombine.low %v2655_v33, %v2662_v34  ;;  %v2676_v45 = vld [vmem:[#allocation2 + $0x40] sm:$0xf]  ;;  %v2693_v7 = vld [vmem:[#allocation2 + $0x3c] sm:$0x8] }
  0x43   :  { %v348_v38 = vsel %vm2640_vm7, %v340_v19, %v347_v27  ;;  %v357_v39 = vsel %vm2640_vm7, %v349_v29, %v2578_v26  ;;  %v369_v40 = vor.u32 %v367_v11, %v366_v30  ;;  %2258 = vmatprep.mubr.msk.bf16.mxu0 %vm628_vm3, %v2071_v17  ;;  %v371_v42 = vrot.slane %v366_v30, 4  ;;  %v2704_v29 = vld [vmem:[#allocation2 + $0x5c] sm:$0xf] }
  0x44   :  { %v2017_v28 = vcombine.low %v339_v6, %v348_v38  ;;  %v375_v43 = vrot.slane %v373_v20, 7  ;;  %v395_v44 = vshrl.u32 %v2655_v33, 16  ;;  %2281 = vmatpush3.bf16.msra.mxu0 %v2401_v13  ;;  %v398_v47 = vshll.u32 %v2655_v33, 16  ;;  %v2685_v0 = vld [vmem:[#allocation2 + $0x44] sm:$0xf] }
  0x45   :  { %v370_v26 = vsel %vm2640_vm7, %v2588_v37, %v369_v40  ;;  %v404_v49 = vshrl.u32 %v2662_v34, 16  ;;  %v407_v54 = vshll.u32 %v2662_v34, 16  ;;  %v2073_v37 = vcombine.low %v2591_v41, %v2676_v45  ;;  %v2713_v6 = vld [vmem:[#allocation2 + $0x54] sm:$0xf]  ;;  %v2715_v17 = vld [vmem:[#allocation2 + $0x58] sm:$0xf] }
  0x46   :  { %2198 = vmatprep.mubr.msk.bf16.mxu1 %vm628_vm3, %v2017_v28  ;;  %v2018_v55 = vcombine.low %v357_v39, %v370_v26  ;;  %v378_v58 = vor.u32 %v376_v36, %v375_v43  ;;  %v380_v60 = vrot.slane %v375_v43, 4  ;;  %v397_v63 = vrot.slane %v395_v44, 7  ;;  %v2727_v40 = vld [vmem:[#allocation2 + $0x50] sm:$0x8] }
  0x47   :  { %2259 = vmatmul.mubr.msk.bf16.gmra.mrb[4].mxu0 %vm628_vm3, %v2072_v24  ;;  %v406_v3 = vrot.slane %v404_v49, 7  ;;  %v447_v5 = vshll.u32 %v2597_v48, 16  ;;  %v2074_v53 = vcombine.low %v2685_v0, %v2597_v48  ;;  %v421_v32 = vshrl.u32 %v2693_v7, 16 }
  0x48   :  { %2199 = vmatmul.mubr.msk.bf16.vlgmr.msra.gmra.mrb[0].mxu1 %vm628_vm3, %v2018_v55  ;;  %v379_v9 = vsel %vm2640_vm7, %v371_v42, %v378_v58  ;;  %v388_v10 = vsel %vm2640_vm7, %v380_v60, %v387_v12  ;;  %v400_v11 = vor.u32 %v398_v47, %v397_v63  ;;  %v402_v13 = vrot.slane %v397_v63, 4  ;;  %2262 = vmatprep.mubr.msk.bf16.mxu0 %vm628_vm3, %v2073_v37 }
  0x49   :  { %2223 = vmatpush3.bf16.msra.mxu1 %v2560_v15  ;;  %v2019_v18 = vcombine.low %v379_v9, %v388_v10  ;;  %v409_v19 = vor.u32 %v407_v54, %v406_v3  ;;  %v411_v27 = vrot.slane %v406_v3, 4  ;;  %v418_v12 = vor.u32 %v416_v46, %v415_v23  ;;  %v2723_v46 = vld [vmem:[#allocation2 + $0x68] sm:$0xf] }
  0x4a   :  { %v401_v30 = vsel %vm2640_vm7, %v2604_v52, %v400_v11  ;;  %v426_v15 = vshrl.u32 %v2676_v45, 16  ;;  %2224 = vmatprep.subr.bf16.mxu1 %v2400_v1  ;;  %v429_v20 = vshll.u32 %v2676_v45, 16  ;;  %v435_v52 = vshrl.u32 %v2685_v0, 16 }
  0x4b   :  { %2202 = vmatprep.mubr.msk.bf16.mxu1 %vm628_vm3, %v2019_v18  ;;  %v410_v48 = vsel %vm2640_vm7, %v402_v13, %v409_v19  ;;  %v438_v41 = vshll.u32 %v2685_v0, 16  ;;  %v419_v36 = vsel %vm2640_vm7, %v411_v27, %v418_v12  ;;  %v2012_v38 = vrot.slane %v421_v32, 11  ;;  %v80_v27 = vld [vmem:[#allocation3 + $0x58] sm:$0xff] }
  0x4c   :  { %v2020_v23 = vcombine.low %v401_v30, %v410_v48  ;;  %v428_v39 = vrot.slane %v426_v15, 7  ;;  %v437_v24 = vrot.slane %v435_v52, 7  ;;  %v449_v28 = vor.u32 %v447_v5, %v446_v4  ;;  %v2744_v4 = vld [vmem:[#allocation2 + $0x64] sm:$0x8] }
  0x4d   :  { %v2075_v42 = vcombine.low %v2713_v6, %v2715_v17  ;;  %v475_v43 = vshrl.u32 %v2704_v29, 16  ;;  %2225 = vmatpush3.bf16.msra.mxu1 %v2400_v1  ;;  %v478_v47 = vshll.u32 %v2704_v29, 16  ;;  %v2076_v49 = vcombine.low %v2704_v29, %v2723_v46  ;;  %v2751_v29 = vld [vmem:[#allocation2 + $0x70] sm:$0xf] }
  0x4e   :  { %v431_v44 = vor.u32 %v429_v20, %v428_v39  ;;  %v433_v26 = vrot.slane %v428_v39, 4  ;;  %v440_v54 = vor.u32 %v438_v41, %v437_v24  ;;  %v442_v55 = vrot.slane %v437_v24, 4 }
  0x4f   :  { %2263 = vmatmul.mubr.msk.bf16.gmra.mrb[8].mxu0 %vm628_vm3, %v2074_v53  ;;  %v477_v58 = vrot.slane %v475_v43, 7  ;;  %v452_v60 = vshrl.u32 %v2727_v40, 16  ;;  %v457_v1 = vshrl.u32 %v2713_v6, 16  ;;  %v460_v3 = vshll.u32 %v2713_v6, 16  ;;  %v83_v43 = vld [vmem:[#allocation3 + $0x70] sm:$0xff] }
  0x50   :  { %2203 = vmatmul.mubr.msk.bf16.gmra.mrb[4].mxu1 %vm628_vm3, %v2020_v23  ;;  %v432_v63 = vsel %vm2640_vm7, %v2012_v38, %v431_v44  ;;  %2266 = vmatprep.mubr.msk.bf16.mxu0 %vm628_vm3, %v2075_v42  ;;  %v466_v37 = vshrl.u32 %v2715_v17, 16  ;;  %v441_v9 = vsel %vm2640_vm7, %v433_v26, %v440_v54  ;;  %v450_v10 = vsel %vm2640_vm7, %v442_v55, %v449_v28  ;;  %v81_v23 = vld [vmem:[#allocation3 + $0x60] sm:$0xff]  ;;  %v2760_v42 = vld [vmem:[#allocation2 + $0x78] sm:$0x8] }
  0x51   :  { %v2021_v5 = vcombine.low %v419_v36, %v432_v63  ;;  %v2013_v11 = vrot.slane %v452_v60, 11  ;;  %v2022_v13 = vcombine.low %v441_v9, %v450_v10  ;;  %v459_v18 = vrot.slane %v457_v1, 7  ;;  %v82_v36 = vld [vmem:[#allocation3 + $0x68] sm:$0xff]  ;;  %v2769_v55 = vld [vmem:[#allocation2 + $0x84] sm:$0xf] }
  0x52   :  { %v468_v19 = vrot.slane %v466_v37, 7  ;;  %v469_v53 = vshll.u32 %v2715_v17, 16  ;;  %v480_v30 = vor.u32 %v478_v47, %v477_v58  ;;  %v483_v12 = vshrl.u32 %v2744_v4, 16  ;;  %v2774_v37 = vld [vmem:[#allocation2 + $0x98] sm:$0xf] }
  0x53   :  { %2206 = vmatprep.mubr.msk.bf16.mxu1 %vm628_vm3, %v2021_v5  ;;  %v488_v32 = vshrl.u32 %v2723_v46, 16  ;;  %v491_v15 = vshll.u32 %v2723_v46, 16  ;;  %v462_v48 = vor.u32 %v460_v3, %v459_v18  ;;  %v464_v20 = vrot.slane %v459_v18, 4  ;;  %v84_v3 = vld [vmem:[#allocation3 + $0x78] sm:$0xff]  ;;  %v2779_v18 = vld [vmem:[#allocation2 + $0x8c] sm:$0x8] }
  0x54   :  { %v471_v52 = vor.u32 %v469_v53, %v468_v19  ;;  %v473_v41 = vrot.slane %v468_v19, 4  ;;  %v2014_v38 = vrot.slane %v483_v12, 11  ;;  %v2133_v24 = vpack.c.bf16 %v80_v27, %v80_v27 }
  0x55   :  { %v2757_v39 = vrot.slane %v488_v32, 7  ;;  %v506_v28 = vshrl.u32 %v2751_v29, 16  ;;  %v463_v44 = vsel %vm2640_vm7, %v2013_v11, %v462_v48  ;;  %v509_v54 = vshll.u32 %v2751_v29, 16 }
  0x56   :  { %v472_v26 = vsel %vm2640_vm7, %v464_v20, %v471_v52  ;;  %v481_v47 = vsel %vm2640_vm7, %v473_v41, %v480_v30  ;;  %160 = vst.msk [vmem:[#allocation2 + $0x6c] sm:$0xf] %vm44_vm0, %v2133_v24  ;;  %v2134_v1 = vpack.c.bf16 %v81_v23, %v81_v23  ;;  %v2135_v5 = vpack.c.bf16 %v82_v36, %v82_v36  ;;  %v1258_v30 = vld [vmem:[#allocation2 + $0x8] sm:$0xf]  ;;  %v2794_v20 = vld [vmem:[#allocation2 + $0xc] sm:$0xf] }
  0x57   :  { %2267 = vmatmul.mubr.msk.bf16.gmra.mrb[12].mxu0 %vm628_vm3, %v2076_v49  ;;  %v2023_v58 = vcombine.low %v463_v44, %v472_v26  ;;  %v493_v60 = vor.u32 %v491_v15, %v2757_v39  ;;  %v508_v63 = vrot.slane %v506_v28, 7  ;;  %v495_v9 = vrot.slane %v2757_v39, 4  ;;  %v1257_v49 = vld [vmem:[#allocation2 + $0x4] sm:$0xf]  ;;  %v2799_v44 = vld [vmem:[#allocation2 + $0x10] sm:$0x1] }
  0x58   :  { %2207 = vmatmul.mubr.msk.bf16.gmra.mrb[8].mxu1 %vm628_vm3, %v2022_v13  ;;  %v514_v10 = vshrl.u32 %v2760_v42, 16  ;;  %v2136_v11 = vpack.c.bf16 %v83_v43, %v83_v43  ;;  %161 = vst.msk [vmem:[#allocation2 + $0x7c] sm:$0xf] %vm44_vm0, %v2134_v1  ;;  %v537_v13 = vshrl.u32 %v2769_v55, 16  ;;  %v540_v27 = vshll.u32 %v2769_v55, 16 }
  0x59   :  { %2210 = vmatprep.mubr.msk.bf16.mxu1 %vm628_vm3, %v2023_v58  ;;  %v494_v19 = vsel %vm2640_vm7, %v2014_v38, %v493_v60  ;;  %v2785_v53 = vor.u32 %v509_v54, %v508_v63  ;;  %vm1289_vm8 = vsmask.f32 3328  ;;  %vm1290_vm9 = vsmask.f32 7440  ;;  %162 = vst.msk [vmem:[#allocation2 + $0x80] sm:$0xf] %vm44_vm0, %v2135_v5 }
  0x5a   :  { %v2024_v12 = vcombine.low %v481_v47, %v494_v19  ;;  %v2790_v32 = vrot.slane %v514_v10, 11  ;;  %163 = vst.msk [vmem:[#allocation2 + $0x90] sm:$0xf] %vm44_vm0, %v2136_v11  ;;  %v2137_v15 = vpack.c.bf16 %v84_v3, %v84_v3  ;;  %v568_v48 = vshrl.u32 %v2774_v37, 16  ;;  %v2804_v60 = vld [vmem:[#allocation2 + $0x18] sm:$0xf]  ;;  %vm2847_vm10 = vmor %vm1289_vm8, %vm1290_vm9 }
  0x5b   :  { %v539_v52 = vrot.slane %v537_v13, 7  ;;  %v571_v41 = vshll.u32 %v2774_v37, 16  ;;  %v545_v23 = vshrl.u32 %v2779_v18, 16  ;;  %v1293_v36 = vshrl.u32 %v1257_v49, 16 }
  0x5c   :  { %164 = vst.msk [vmem:[#allocation2 + $0x94] sm:$0xf] %vm44_vm0, %v2137_v15  ;;  %v570_v38 = vrot.slane %v568_v48, 7  ;;  %v1296_v24 = vshll.u32 %v1257_v49, 16  ;;  %v1302_v28 = vshll.u32 %v1258_v30, 16  ;;  %v1306_v43 = vshrl.u32 %v1258_v30, 16 }
  0x5d   :  { %v542_v26 = vor.u32 %v540_v27, %v539_v52  ;;  %v2801_v47 = vrot.slane %v545_v23, 11  ;;  %v1295_v54 = vrot.slane %v1293_v36, 4  ;;  %v1312_v58 = vshll.u32 %v2794_v20, 16  ;;  %v2806_v63 = vld [vmem:[#allocation2 + $0x6c] sm:$0xf] }
  0x5e   :  { %v2808_v1 = vor.u32 %v571_v41, %v570_v38  ;;  %v1298_v3 = vrot.slane %v1296_v24, 5  ;;  %v2810_v5 = vrot.slane %v1302_v28, 5  ;;  %v1308_v10 = vrot.slane %v1306_v43, 4 }
  0x5f   :  { %v2077_v11 = vcombine.low %v2806_v63, %v2751_v29  ;;  %v497_v49 = vshrl.u32 %v2806_v63, 16  ;;  %v500_v19 = vshll.u32 %v2806_v63, 16  ;;  %v2816_v13 = vrot.slane %v1312_v58, 5  ;;  %v2819_v27 = vld [vmem:[#allocation2 + $0x7c] sm:$0xf] }
  0x60   :  { %2211 = vmatmul.mubr.msk.bf16.gmra.mrb[12].mxu1 %vm628_vm3, %v2024_v12  ;;  %v1299_v30 = vor.u32 %v1298_v3, %v1295_v54  ;;  %v1309_v15 = vor.u32 %v1308_v10, %v2810_v5  ;;  %v1316_v48 = vshrl.u32 %v2794_v20, 16  ;;  %v1322_v52 = vshll.u32 %v2799_v44, 16  ;;  %v2825_v29 = vld [vmem:[#allocation2 + $0x80] sm:$0xf] }
  0x61   :  { %2270 = vmatprep.mubr.msk.bf16.mxu0 %vm628_vm3, %v2077_v11  ;;  %v499_v41 = vrot.slane %v497_v49, 7  ;;  %v519_v23 = vshrl.u32 %v2819_v27, 16  ;;  %v522_v36 = vshll.u32 %v2819_v27, 16  ;;  %v1327_v12 = vshrl.u32 %v2804_v60, 16  ;;  %v2834_v28 = vld [vmem:[#allocation2 + $0x90] sm:$0xf] }
  0x62   :  { %v2078_v38 = vcombine.low %v2819_v27, %v2825_v29  ;;  %v528_v24 = vshrl.u32 %v2825_v29, 16  ;;  %v531_v20 = vshll.u32 %v2825_v29, 16  ;;  %v1300_v43 = vrot.slane %v1299_v30, 4 }
  0x63   :  { %v502_v44 = vor.u32 %v500_v19, %v499_v41  ;;  %v504_v54 = vrot.slane %v499_v41, 4  ;;  %v521_v58 = vrot.slane %v519_v23, 7  ;;  %v2079_v3 = vcombine.low %v2769_v55, %v2834_v28  ;;  %v2838_v10 = vld [vmem:[#allocation2 + $0x94] sm:$0xf]  ;;  %v2121_v19 = vld [vmem:[%s3075_s2] ss:$0 sm:$0xff] }
  0x64   :  { %2271 = vmatmul.mubr.msk.bf16.gmra.mrb[16].mxu0 %vm628_vm3, %v2078_v38  ;;  %v530_v11 = vrot.slane %v528_v24, 7  ;;  %v2080_v49 = vcombine.low %v2838_v10, %v2774_v37  ;;  %v550_v25 = vshrl.u32 %v2834_v28, 16  ;;  %v553_v62 = vshll.u32 %v2834_v28, 16  ;;  %s2485_s2 = smov [#allocation8]  }
  0x65   :  { %v503_v55 = vsel %vm2640_vm7, %v495_v9, %v502_v44  ;;  %v512_v30 = vsel %vm2640_vm7, %v504_v54, %v2785_v53  ;;  %v524_v37 = vor.u32 %v522_v36, %v521_v58  ;;  %v526_v41 = vrot.slane %v521_v58, 4  ;;  %2274 = vmatprep.mubr.msk.bf16.mxu0 %vm628_vm3, %v2079_v3  ;;  %s1975_s13 = sshll.u32 %s2485_s2, 4  ;;  %s1976_s13 = int_to_ptr.vmem [resolvable:$true] %s1975_s13 }
  0x66   :  { %v2025_v23 = vcombine.low %v503_v55, %v512_v30  ;;  %v533_v38 = vor.u32 %v531_v20, %v530_v11  ;;  %v535_v24 = vrot.slane %v530_v11, 4  ;;  %v552_v57 = vrot.slane %v550_v25, 7  ;;  %v1262_v11 = vld [vmem:[#allocation2 + $0x1c] sm:$0xf]  ;;  %s2450_s14 = scalar_lea.vmem %s1976_s13, 128  ;;  %p2455_p3 = scmp.lt.s32.totalorder %s1976_s13, %s1976_s13 }
  0x67   :  { %v525_v21 = vsel %vm2640_vm7, %v2790_v32, %v524_v37  ;;  %v559_v39 = vshrl.u32 %v2838_v10, 16  ;;  %v562_v9 = vshll.u32 %v2838_v10, 16  ;;  %v1305_v53 = vsel %vm2847_vm10, %v1300_v43, %v2810_v5  ;;  %p2451_p2 = scmp.ne.s32.totalorder %s1976_s13, %s2450_s14  ;;  %p2456_p4 = scmp.lt.s32.totalorder %s2450_s14, %s2450_s14 }
  0x68   :  { %2214 = vmatprep.mubr.msk.bf16.mxu1 %vm628_vm3, %v2025_v23  ;;  %v534_v36 = vsel %vm2640_vm7, %v526_v41, %v533_v38  ;;  %v543_v25 = vsel %vm2640_vm7, %v535_v24, %v542_v26  ;;  %v555_v20 = vor.u32 %v553_v62, %v552_v57  ;;  %v557_v44 = vrot.slane %v552_v57, 4 }
  0x69   :  { %v2026_v54 = vcombine.low %v525_v21, %v534_v36  ;;  %v561_v32 = vrot.slane %v559_v39, 7  ;;  %v1310_v58 = vrot.slane %v1309_v15, 4  ;;  %v1318_v3 = vrot.slane %v1316_v48, 4  ;;  %v1263_v48 = vld [vmem:[#allocation2 + $0x20] sm:$0xf]  ;;  %p2457_p5 = por %p2456_p4, %p2455_p3 }
  0x6a   :  { %v556_v55 = vsel %vm2640_vm7, %v2801_v47, %v555_v20  ;;  %v1324_v5 = vrot.slane %v1322_v52, 5  ;;  %v1329_v43 = vrot.slane %v1327_v12, 4  ;;  %v1330_v30 = vshll.u32 %v2804_v60, 16 }
  0x6b   :  { %2215 = vmatmul.mubr.msk.bf16.gmra.mrb[16].mxu1 %vm628_vm3, %v2026_v54  ;;  %v2027_v37 = vcombine.low %v543_v25, %v556_v55  ;;  %v564_v41 = vor.u32 %v562_v9, %v561_v32  ;;  %v566_v26 = vrot.slane %v561_v32, 4  ;;  %v1315_v21 = vsel %vm2847_vm10, %v1310_v58, %v2816_v13  ;;  %v1265_v9 = vld [vmem:[#allocation2 + $0x2c] sm:$0xf]  ;;  %v1266_v25 = vld [vmem:[#allocation2 + $0x30] sm:$0xf]  ;;  %p2458_p6 = pnand %p2457_p5, %p2451_p2 }
  0x6c   :  { %2275 = vmatmul.mubr.msk.bf16.gmra.mrb[20].mxu0 %vm628_vm3, %v2080_v49  ;;  %v1319_v57 = vor.u32 %v1318_v3, %v2816_v13  ;;  %v2095_v62 = vcombine.low %v1305_v53, %v1315_v21  ;;  %v1332_v15 = vrot.slane %v1330_v30, 5  ;;  %v1336_v47 = vshll.u32 %v1262_v11, 16  ;;  %v1267_v30 = vld [vmem:[#allocation2 + $0x34] sm:$0xf] }
  0x6d   :  { %2218 = vmatprep.mubr.msk.bf16.mxu1 %vm628_vm3, %v2027_v37  ;;  %v565_v60 = vsel %vm2640_vm7, %v557_v44, %v564_v41  ;;  %v574_v52 = vsel %vm2640_vm7, %v566_v26, %v2808_v1  ;;  %v3084_v12 = vrot.slane %v2564_v16, 11  ;;  %v3085_v49 = vrot.slane %v2601_v51, 7  ;;  %v1264_v1 = vld [vmem:[#allocation2 + $0x24] sm:$0x1] }
  0x6e   :  { %v2028_v38 = vcombine.low %v565_v60, %v574_v52  ;;  %v1320_v24 = vrot.slane %v1319_v57, 4  ;;  %2282 = vmatprep.mubr.msk.bf16.mxu0 %vm628_vm3, %v2095_v62  ;;  %v1333_v39 = vor.u32 %v1332_v15, %v1329_v43  ;;  %v1338_v8 = vrot.slane %v1336_v47, 5  ;;  %v172_v47 = vld [vmem:[#allocation2 + $0x20] sm:$0x7] }
  0x6f   :  { %v235_v13 = vsel %vm2618_vm6, %v3084_v12, %v234_v56  ;;  %v238_v23 = vsel %vm2618_vm6, %v2631_v2, %v3085_v49  ;;  %v3086_v16 = vrot.slane %v2612_v59, 7  ;;  %v3087_v53 = vrot.slane %v2572_v22, 11 }
  0x70   :  { %v2043_v50 = vcombine.low %v235_v13, %v238_v23  ;;  %v1340_v56 = vshrl.u32 %v1262_v11, 16  ;;  %v1346_v36 = vshll.u32 %v1263_v48, 16  ;;  %v1325_v2 = vsel %vm2847_vm10, %v1320_v24, %v1324_v5 }
  0x71   :  { %v245_v51 = vsel %vm2618_vm6, %v3087_v53, %v3086_v16  ;;  %v1334_v20 = vrot.slane %v1333_v39, 4  ;;  %v1350_v54 = vshrl.u32 %v1263_v48, 16  ;;  %v1356_v3 = vshll.u32 %v1264_v1, 16 }
  0x72   :  { %v2044_v44 = vcombine.low %v2650_v14, %v245_v51  ;;  %v1342_v32 = vrot.slane %v1340_v56, 4  ;;  %v1348_v58 = vrot.slane %v1346_v36, 5  ;;  %v1361_v55 = vshrl.u32 %v1265_v9, 16  ;;  %v1269_v56 = vld [vmem:[#allocation2 + $0x40] sm:$0xf] }
  0x73   :  { %v1339_v22 = vsel %vm2847_vm10, %v1334_v20, %v1338_v8  ;;  %v1352_v43 = vrot.slane %v1350_v54, 4  ;;  %v1364_v37 = vshll.u32 %v1265_v9, 16  ;;  %v1370_v11 = vshll.u32 %v1266_v25, 16  ;;  %2219 = vmatmul.mubr.msk.bf16.gmra.mrb[20].mxu1 %vm628_vm3, %v2028_v38 }
  0x74   :  { %v2096_v41 = vcombine.low %v1325_v2, %v1339_v22  ;;  %v1343_v26 = vor.u32 %v1342_v32, %v1338_v8  ;;  %v1358_v5 = vrot.slane %v1356_v3, 5  ;;  %v1363_v21 = vrot.slane %v1361_v55, 4  ;;  %2226 = vmatprep.mubr.msk.bf16.mxu1 %vm628_vm3, %v2043_v50  ;;  %v1268_v50 = vld [vmem:[#allocation2 + $0x38] sm:$0x1] }
  0x75   :  { %v1353_v14 = vor.u32 %v1352_v43, %v1348_v58  ;;  %v1366_v57 = vrot.slane %v1364_v37, 5  ;;  %v1372_v62 = vrot.slane %v1370_v11, 5  ;;  %v1374_v15 = vshrl.u32 %v1266_v25, 16  ;;  %v1271_v11 = vld [vmem:[#allocation2 + $0x48] sm:$0xf] }
  0x76   :  { %2283 = vmatmul.mubr.msk.bf16.vlgmr.msra.gmra.mrb[0].mxu0 %vm628_vm3, %v2096_v41  ;;  %v1344_v48 = vrot.slane %v1343_v26, 4  ;;  %v1380_v60 = vshll.u32 %v1267_v30, 16  ;;  %v1384_v52 = vshrl.u32 %v1267_v30, 16  ;;  %v3088_v12 = vmov %v3086_v16  ;;  %v1272_v41 = vld [vmem:[#allocation2 + $0x4c] sm:$0x1] }
  0x77   :  { %v246_v13 = vrot.slane %v3088_v12, 4  ;;  %v1354_v49 = vrot.slane %v1353_v14, 4  ;;  %v1367_v23 = vor.u32 %v1366_v57, %v1363_v21  ;;  %v1376_v38 = vrot.slane %v1374_v15, 4  ;;  %v176_v12 = vld [vmem:[#allocation2 + $0x34] sm:$0x7] }
  0x78   :  { %v247_v24 = vrot.slane %v2653_v31, 7  ;;  %v1349_v39 = vsel %vm2847_vm10, %v1344_v48, %v1348_v58  ;;  %v1382_v8 = vrot.slane %v1380_v60, 5  ;;  %v250_v1 = vrot.slane %v172_v47, 7 }
  0x79   :  { %v2003_v9 = vrot.slane %v2586_v35, 11  ;;  %v1359_v16 = vsel %vm2847_vm10, %v1354_v49, %v1358_v5  ;;  %v1368_v53 = vrot.slane %v1367_v23, 4  ;;  %v1377_v51 = vor.u32 %v1376_v38, %v1372_v62 }
  0x7a   :  { %v248_v59 = vsel %vm2618_vm6, %v246_v13, %v247_v24  ;;  %v2097_v36 = vcombine.low %v1349_v39, %v1359_v16  ;;  %v249_v25 = vrot.slane %v247_v24, 4  ;;  %v254_v31 = vrot.slane %v2655_v33, 7  ;;  %v1270_v33 = vld [vmem:[#allocation2 + $0x44] sm:$0xf]  ;;  %v180_v24 = vld [vmem:[#allocation2 + $0x48] sm:$0x7] }
  0x7b   :  { %v257_v2 = vrot.slane %v2662_v34, 7  ;;  %v1373_v20 = vsel %vm2847_vm10, %v1368_v53, %v1372_v62  ;;  %v1378_v35 = vrot.slane %v1377_v51, 4  ;;  %v1386_v54 = vrot.slane %v1384_v52, 4  ;;  %2227 = vmatmul.mubr.msk.bf16.vlgmr.msra.gmra.mrb[0].mxu1 %vm628_vm3, %v2044_v44 }
  0x7c   :  { %v1390_v32 = vshll.u32 %v1268_v50, 16  ;;  %2286 = vmatprep.mubr.msk.bf16.mxu0 %vm628_vm3, %v2097_v36  ;;  %v251_v58 = vsel %vm2618_vm6, %v249_v25, %v250_v1  ;;  %v255_v3 = vsel %vm2618_vm6, %v2003_v9, %v254_v31  ;;  %v256_v55 = vrot.slane %v254_v31, 4  ;;  %v1273_v31 = vld [vmem:[#allocation2 + $0x54] sm:$0xf] }
  0x7d   :  { %v1395_v22 = vshrl.u32 %v1269_v56, 16  ;;  %v1383_v34 = vsel %vm2847_vm10, %v1378_v35, %v1382_v8  ;;  %v2045_v43 = vcombine.low %v248_v59, %v251_v58  ;;  %v1387_v30 = vor.u32 %v1386_v54, %v1382_v8 }
  0x7e   :  { %v1392_v37 = vrot.slane %v1390_v32, 5  ;;  %v2098_v44 = vcombine.low %v1373_v20, %v1383_v34  ;;  %v258_v26 = vsel %vm2618_vm6, %v256_v55, %v257_v2  ;;  %v1398_v21 = vshll.u32 %v1269_v56, 16  ;;  %v1274_v32 = vld [vmem:[#allocation2 + $0x58] sm:$0xf] }
  0x7f   :  { %v1397_v5 = vrot.slane %v1395_v22, 4  ;;  %2230 = vmatprep.mubr.msk.bf16.mxu1 %vm628_vm3, %v2045_v43  ;;  %v2046_v14 = vcombine.low %v255_v3, %v258_v26  ;;  %v1388_v57 = vrot.slane %v1387_v30, 4  ;;  %v1404_v62 = vshll.u32 %v1270_v33, 16  ;;  %v1275_v22 = vld [vmem:[#allocation2 + $0x5c] sm:$0xf] }
  0x80   :  { %v1408_v15 = vshrl.u32 %v1270_v33, 16  ;;  %2287 = vmatmul.mubr.msk.bf16.gmra.mrb[4].mxu0 %vm628_vm3, %v2098_v44  ;;  %v1400_v47 = vrot.slane %v1398_v21, 5  ;;  %v1414_v48 = vshll.u32 %v1271_v11, 16  ;;  %v1418_v60 = vshrl.u32 %v1271_v11, 16  ;;  %v1277_v44 = vld [vmem:[#allocation2 + $0x68] sm:$0xf] }
  0x81   :  { %v1424_v52 = vshll.u32 %v1272_v41, 16  ;;  %v1393_v13 = vsel %vm2847_vm10, %v1388_v57, %v1392_v37  ;;  %v1406_v49 = vrot.slane %v1404_v62, 5  ;;  %v259_v38 = vrot.slane %v257_v2, 4  ;;  %v1276_v41 = vld [vmem:[#allocation2 + $0x60] sm:$0x1] }
  0x82   :  { %v1410_v23 = vrot.slane %v1408_v15, 4  ;;  %v1401_v39 = vor.u32 %v1400_v47, %v1397_v5  ;;  %v1416_v8 = vrot.slane %v1414_v48, 5  ;;  %v1420_v1 = vrot.slane %v1418_v60, 4  ;;  %v1278_v57 = vld [vmem:[#allocation2 + $0x6c] sm:$0xf] }
  0x83   :  { %v1426_v9 = vrot.slane %v1424_v52, 5  ;;  %v260_v16 = vrot.slane %v176_v12, 7  ;;  %v2004_v53 = vrot.slane %v2693_v7, 11  ;;  %v264_v51 = vrot.slane %v2676_v45, 7  ;;  %2231 = vmatmul.mubr.msk.bf16.gmra.mrb[4].mxu1 %vm628_vm3, %v2046_v14 }
  0x84   :  { %v1411_v50 = vor.u32 %v1410_v23, %v1406_v49  ;;  %v1402_v59 = vrot.slane %v1401_v39, 4  ;;  %v1421_v56 = vor.u32 %v1420_v1, %v1416_v8  ;;  %v267_v36 = vrot.slane %v2685_v0, 7 }
  0x85   :  { %v270_v25 = vrot.slane %v180_v24, 7  ;;  %v261_v20 = vsel %vm2618_vm6, %v259_v38, %v260_v16  ;;  %v265_v35 = vsel %vm2618_vm6, %v2004_v53, %v264_v51  ;;  %v266_v54 = vrot.slane %v264_v51, 4 }
  0x86   :  { %v1412_v2 = vrot.slane %v1411_v50, 4  ;;  %v1407_v45 = vsel %vm2847_vm10, %v1402_v59, %v1406_v49  ;;  %v1422_v7 = vrot.slane %v1421_v56, 4  ;;  %v2047_v58 = vcombine.low %v261_v20, %v265_v35  ;;  %v184_v50 = vld [vmem:[#allocation2 + $0x5c] sm:$0x7] }
  0x87   :  { %v269_v3 = vrot.slane %v267_v36, 4  ;;  %v2099_v55 = vcombine.low %v1393_v13, %v1407_v45  ;;  %v268_v33 = vsel %vm2618_vm6, %v266_v54, %v267_v36  ;;  %v1429_v34 = vshrl.u32 %v1273_v31, 16 }
  0x88   :  { %v1417_v0 = vsel %vm2847_vm10, %v1412_v2, %v1416_v8  ;;  %v1427_v43 = vsel %vm2847_vm10, %v1422_v7, %v1426_v9  ;;  %2234 = vmatprep.mubr.msk.bf16.mxu1 %vm628_vm3, %v2047_v58  ;;  %v1432_v37 = vshll.u32 %v1273_v31, 16  ;;  %v1438_v11 = vshll.u32 %v1274_v32, 16 }
  0x89   :  { %v271_v30 = vsel %vm2618_vm6, %v269_v3, %v270_v25  ;;  %2290 = vmatprep.mubr.msk.bf16.mxu0 %vm628_vm3, %v2099_v55  ;;  %v2100_v26 = vcombine.low %v1417_v0, %v1427_v43  ;;  %v1431_v21 = vrot.slane %v1429_v34, 4  ;;  %v1442_v14 = vshrl.u32 %v1274_v32, 16  ;;  %v1279_v3 = vld [vmem:[#allocation2 + $0x70] sm:$0xf] }
  0x8a   :  { %v2048_v5 = vcombine.low %v268_v33, %v271_v30  ;;  %v1434_v62 = vrot.slane %v1432_v37, 5  ;;  %v1440_v15 = vrot.slane %v1438_v11, 5  ;;  %v1448_v47 = vshll.u32 %v1275_v22, 16  ;;  %v1280_v33 = vld [vmem:[#allocation2 + $0x74] sm:$0x1] }
  0x8b   :  { %v1452_v48 = vshrl.u32 %v1275_v22, 16  ;;  %2291 = vmatmul.mubr.msk.bf16.gmra.mrb[8].mxu0 %vm628_vm3, %v2100_v26  ;;  %v1444_v60 = vrot.slane %v1442_v14, 4  ;;  %v1458_v52 = vshll.u32 %v1276_v41, 16  ;;  %v1463_v12 = vshrl.u32 %v1277_v44, 16  ;;  %v1281_v30 = vld [vmem:[#allocation2 + $0x7c] sm:$0xf] }
  0x8c   :  { %v1466_v13 = vshll.u32 %v1277_v44, 16  ;;  %2235 = vmatmul.mubr.msk.bf16.gmra.mrb[8].mxu1 %vm628_vm3, %v2048_v5  ;;  %v1435_v49 = vor.u32 %v1434_v62, %v1431_v21  ;;  %v1450_v23 = vrot.slane %v1448_v47, 5  ;;  %v1472_v24 = vshll.u32 %v1278_v57, 16 }
  0x8d   :  { %v1454_v38 = vrot.slane %v1452_v48, 4  ;;  %v1445_v39 = vor.u32 %v1444_v60, %v1440_v15  ;;  %v1460_v8 = vrot.slane %v1458_v52, 5  ;;  %v1465_v1 = vrot.slane %v1463_v12, 4 }
  0x8e   :  { %v1468_v9 = vrot.slane %v1466_v13, 5  ;;  %v1436_v16 = vrot.slane %v1435_v49, 4  ;;  %v1474_v51 = vrot.slane %v1472_v24, 5  ;;  %v1476_v59 = vshrl.u32 %v1278_v57, 16  ;;  %v1283_v57 = vld [vmem:[#allocation2 + $0x84] sm:$0xf] }
  0x8f   :  { %v1455_v53 = vor.u32 %v1454_v38, %v1450_v23  ;;  %v1446_v56 = vrot.slane %v1445_v39, 4  ;;  %v2005_v25 = vrot.slane %v2727_v40, 11  ;;  %v274_v31 = vrot.slane %v2713_v6, 7  ;;  %v188_v24 = vld [vmem:[#allocation2 + $0x70] sm:$0x7] }
  0x90   :  { %v1469_v36 = vor.u32 %v1468_v9, %v1465_v1  ;;  %v1441_v2 = vsel %vm2847_vm10, %v1436_v16, %v1440_v15  ;;  %v277_v35 = vrot.slane %v2715_v17, 7  ;;  %v280_v54 = vrot.slane %v184_v50, 7 }
  0x91   :  { %v1456_v20 = vrot.slane %v1455_v53, 4  ;;  %v1451_v32 = vsel %vm2847_vm10, %v1446_v56, %v1450_v23  ;;  %v275_v7 = vsel %vm2618_vm6, %v2005_v25, %v274_v31  ;;  %v276_v58 = vrot.slane %v274_v31, 4 }
  0x92   :  { %v1470_v45 = vrot.slane %v1469_v36, 4  ;;  %v2101_v55 = vcombine.low %v1441_v2, %v1451_v32  ;;  %v279_v40 = vrot.slane %v277_v35, 4  ;;  %v2006_v0 = vrot.slane %v2744_v4, 11  ;;  %v1282_v4 = vld [vmem:[#allocation2 + $0x80] sm:$0xf] }
  0x93   :  { %v1461_v6 = vsel %vm2847_vm10, %v1456_v20, %v1460_v8  ;;  %v278_v22 = vsel %vm2618_vm6, %v276_v58, %v277_v35  ;;  %v284_v34 = vrot.slane %v2723_v46, 7  ;;  %v1478_v43 = vrot.slane %v1476_v59, 4  ;;  %v1285_v58 = vld [vmem:[#allocation2 + $0x90] sm:$0xf] }
  0x94   :  { %v1475_v17 = vsel %vm2847_vm10, %v1470_v45, %v1474_v51  ;;  %2294 = vmatprep.mubr.msk.bf16.mxu0 %vm628_vm3, %v2101_v55  ;;  %v2049_v11 = vcombine.low %v275_v7, %v278_v22  ;;  %v281_v41 = vsel %vm2618_vm6, %v279_v40, %v280_v54  ;;  %v1482_v44 = vshll.u32 %v1279_v3, 16  ;;  %v1284_v54 = vld [vmem:[#allocation2 + $0x88] sm:$0x1]  ;;  %v1286_v40 = vld [vmem:[#allocation2 + $0x94] sm:$0xf] }
  0x95   :  { %v2102_v37 = vcombine.low %v1461_v6, %v1475_v17  ;;  %v285_v26 = vsel %vm2618_vm6, %v2006_v0, %v284_v34  ;;  %v1479_v5 = vor.u32 %v1478_v43, %v1474_v51  ;;  %v1486_v21 = vshrl.u32 %v1279_v3, 16 }
  0x96   :  { %v1492_v14 = vshll.u32 %v1280_v33, 16  ;;  %2238 = vmatprep.mubr.msk.bf16.mxu1 %vm628_vm3, %v2049_v11  ;;  %v2050_v46 = vcombine.low %v281_v41, %v285_v26  ;;  %v1484_v62 = vrot.slane %v1482_v44, 5  ;;  %v1497_v15 = vshrl.u32 %v1281_v30, 16 }
  0x97   :  { %2295 = vmatmul.mubr.msk.bf16.gmra.mrb[12].mxu0 %vm628_vm3, %v2102_v37  ;;  %v1500_v47 = vshll.u32 %v1281_v30, 16  ;;  %v1480_v48 = vrot.slane %v1479_v5, 4  ;;  %v1488_v60 = vrot.slane %v1486_v21, 4  ;;  %v1506_v12 = vshll.u32 %v1282_v4, 16  ;;  %v1287_v30 = vld [vmem:[#allocation2 + $0x98] sm:$0xf] }
  0x98   :  { %v1494_v52 = vrot.slane %v1492_v14, 5  ;;  %2239 = vmatmul.mubr.msk.bf16.gmra.mrb[12].mxu1 %vm628_vm3, %v2050_v46  ;;  %v1499_v13 = vrot.slane %v1497_v15, 4  ;;  %v1510_v23 = vshrl.u32 %v1282_v4, 16  ;;  %v1516_v38 = vshll.u32 %v1283_v57, 16  ;;  %v1288_v4 = vld [vmem:[#allocation2 + $0x9c] sm:$0x1] }
  0x99   :  { %v1502_v49 = vrot.slane %v1500_v47, 5  ;;  %v1485_v39 = vsel %vm2847_vm10, %v1480_v48, %v1484_v62  ;;  %v1489_v8 = vor.u32 %v1488_v60, %v1484_v62  ;;  %v1508_v1 = vrot.slane %v1506_v12, 5 }
  0x9a   :  { %v1520_v9 = vshrl.u32 %v1283_v57, 16  ;;  %v1512_v16 = vrot.slane %v1510_v23, 4  ;;  %v1518_v53 = vrot.slane %v1516_v38, 5  ;;  %v286_v51 = vrot.slane %v284_v34, 4  ;;  %v192_v57 = vld [vmem:[#allocation2 + $0x84] sm:$0x7] }
  0x9b   :  { %v1503_v50 = vor.u32 %v1502_v49, %v1499_v13  ;;  %v1490_v59 = vrot.slane %v1489_v8, 4  ;;  %v287_v56 = vrot.slane %v2806_v63, 7  ;;  %v290_v36 = vrot.slane %v188_v24, 7  ;;  %v196_v24 = vld [vmem:[#allocation2 + $0x98] sm:$0x7] }
  0x9c   :  { %v2007_v25 = vrot.slane %v2760_v42, 11  ;;  %v1513_v2 = vor.u32 %v1512_v16, %v1508_v1  ;;  %v294_v20 = vrot.slane %v2819_v27, 7  ;;  %v297_v35 = vrot.slane %v2825_v29, 7 }
  0x9d   :  { %v1504_v31 = vrot.slane %v1503_v50, 4  ;;  %v1495_v32 = vsel %vm2847_vm10, %v1490_v59, %v1494_v52  ;;  %v288_v45 = vsel %vm2618_vm6, %v286_v51, %v287_v56  ;;  %v289_v7 = vrot.slane %v287_v56, 4 }
  0x9e   :  { %v1522_v3 = vrot.slane %v1520_v9, 4  ;;  %v2103_v63 = vcombine.low %v1485_v39, %v1495_v32  ;;  %v1514_v55 = vrot.slane %v1513_v2, 4  ;;  %v295_v27 = vsel %vm2618_vm6, %v2007_v25, %v294_v20 }
  0x9f   :  { %v1509_v42 = vsel %vm2847_vm10, %v1504_v31, %v1508_v1  ;;  %v291_v29 = vsel %vm2618_vm6, %v289_v7, %v290_v36  ;;  %v296_v6 = vrot.slane %v294_v20, 4  ;;  %v1526_v33 = vshll.u32 %v1284_v54, 16 }
  0xa0   :  { %v1523_v0 = vor.u32 %v1522_v3, %v1518_v53  ;;  %2298 = vmatprep.mubr.msk.bf16.mxu0 %vm628_vm3, %v2103_v63  ;;  %v1519_v17 = vsel %vm2847_vm10, %v1514_v55, %v1518_v53  ;;  %v2051_v22 = vcombine.low %v288_v45, %v291_v29  ;;  %v1531_v34 = vshrl.u32 %v1285_v58, 16 }
  0xa1   :  { %v1534_v43 = vshll.u32 %v1285_v58, 16  ;;  %v2104_v37 = vcombine.low %v1509_v42, %v1519_v17  ;;  %v298_v11 = vsel %vm2618_vm6, %v296_v6, %v297_v35  ;;  %v1528_v44 = vrot.slane %v1526_v33, 5 }
  0xa2   :  { %v1524_v41 = vrot.slane %v1523_v0, 4  ;;  %2242 = vmatprep.mubr.msk.bf16.mxu1 %vm628_vm3, %v2051_v22  ;;  %v2052_v26 = vcombine.low %v295_v27, %v298_v11  ;;  %v1533_v5 = vrot.slane %v1531_v34, 4  ;;  %v1540_v14 = vshll.u32 %v1286_v40, 16 }
  0xa3   :  { %v1536_v21 = vrot.slane %v1534_v43, 5  ;;  %2299 = vmatmul.mubr.msk.bf16.gmra.mrb[16].mxu0 %vm628_vm3, %v2104_v37  ;;  %v1544_v62 = vshrl.u32 %v1286_v40, 16  ;;  %v1550_v15 = vshll.u32 %v1287_v30, 16  ;;  %v1554_v47 = vshrl.u32 %v1287_v30, 16 }
  0xa4   :  { %v1529_v46 = vsel %vm2847_vm10, %v1524_v41, %v1528_v44  ;;  %2243 = vmatmul.mubr.msk.bf16.gmra.mrb[16].mxu1 %vm628_vm3, %v2052_v26  ;;  %v1542_v60 = vrot.slane %v1540_v14, 5  ;;  %v1560_v52 = vshll.u32 %v1288_v4, 16  ;;  %v299_v12 = vrot.slane %v297_v35, 4 }
  0xa5   :  { %v1537_v48 = vor.u32 %v1536_v21, %v1533_v5  ;;  %v1546_v13 = vrot.slane %v1544_v62, 4  ;;  %v1552_v49 = vrot.slane %v1550_v15, 5  ;;  %v1556_v23 = vrot.slane %v1554_v47, 4 }
  0xa6   :  { %v300_v38 = vrot.slane %v192_v57, 7  ;;  %v1562_v8 = vrot.slane %v1560_v52, 5  ;;  %v2008_v1 = vrot.slane %v2779_v18, 11  ;;  %v304_v9 = vrot.slane %v2834_v28, 7 }
  0xa7   :  { %v1538_v39 = vrot.slane %v1537_v48, 4  ;;  %v1547_v50 = vor.u32 %v1546_v13, %v1542_v60  ;;  %v1557_v16 = vor.u32 %v1556_v23, %v1552_v49  ;;  %v307_v51 = vrot.slane %v2838_v10, 7 }
  0xa8   :  { %v301_v53 = vsel %vm2618_vm6, %v299_v12, %v300_v38  ;;  %v305_v56 = vsel %vm2618_vm6, %v2008_v1, %v304_v9  ;;  %v306_v36 = vrot.slane %v304_v9, 4  ;;  %v310_v25 = vrot.slane %v196_v24, 7 }
  0xa9   :  { %v1543_v59 = vsel %vm2847_vm10, %v1538_v39, %v1542_v60  ;;  %v1548_v2 = vrot.slane %v1547_v50, 4  ;;  %v1558_v18 = vrot.slane %v1557_v16, 4  ;;  %v2053_v20 = vcombine.low %v301_v53, %v305_v56 }
  0xaa   :  { %v2105_v31 = vcombine.low %v1529_v46, %v1543_v59  ;;  %v308_v28 = vsel %vm2618_vm6, %v306_v36, %v307_v51  ;;  %v309_v35 = vrot.slane %v307_v51, 4  ;;  %v1806_v58 = vlaneseq }
  0xab   :  { %v1553_v10 = vsel %vm2847_vm10, %v1548_v2, %v1552_v49  ;;  %v1563_v54 = vsel %vm2847_vm10, %v1558_v18, %v1562_v8  ;;  %2246 = vmatprep.mubr.msk.bf16.mxu1 %vm628_vm3, %v2053_v20  ;;  %vm1953_vm12 = vcmask 1041409   ;;  %vm1955_vm13 = vcmask 1042434  }
  0xac   :  { %2302 = vmatprep.mubr.msk.bf16.mxu0 %vm628_vm3, %v2105_v31  ;;  %v2106_v32 = vcombine.low %v1553_v10, %v1563_v54  ;;  %v311_v45 = vsel %vm2618_vm6, %v309_v35, %v310_v25  ;;  %v1807_v3 = vshrl.u32 %v1806_v58, 7  ;;  %vm1957_vm14 = vcmask 1043459  }
  0xad   :  { %v2054_v7 = vcombine.low %v308_v28, %v311_v45  ;;  %vm1961_vm15 = vcmask 1045509   ;;  %vm1963_vm0 = vcmask 1046534   ;;  %vm1965_vm1 = vcmask 1047559  }
  0xae   :  { %2303 = vmatmul.mubr.msk.bf16.gmra.mrb[20].mxu0 %vm628_vm3, %v2106_v32  ;;  %v1808_v27 = vadd.s32 16, %v1807_v3 }
  0xaf   :  { %2247 = vmatmul.mubr.msk.bf16.gmra.mrb[20].mxu1 %vm628_vm3, %v2054_v7 }
  0xb0   :  { %vm3039_vm11 = vcmp.lt.s32.totalorder %v1808_v27, %v2121_v19 }
 0x149   :  { %v2284_v63 = vpop.f32.mrb[0].mxu0 }
 0x14a   :  { %v1687_v42 = vpop.f32.mrb[1].mxu0 }
 0x14b   :  { %v2285_v55 = vpop.f32.mrb[2].mxu0 }
 0x14c   :  { %v1690_v29 = vpop.f32.mrb[3].mxu0 }
 0x14e   :  { %v2228_v6 = vpop.f32.mrb[0].mxu1 }
 0x14f   :  { %v2306_v40 = vadd.f32 %v2284_v63, %v2228_v6  ;;  %v912_v0 = vpop.f32.mrb[1].mxu1 }
 0x150   :  { %v2307_v33 = vadd.f32 %v1687_v42, %v912_v0  ;;  %v2229_v17 = vpop.f32.mrb[2].mxu1 }
 0x151   :  { %v1817_v22 = vsel %vm3039_vm11, %v2306_v40, -3.4028235e+38  ;;  %v2308_v34 = vadd.f32 %v2285_v55, %v2229_v17  ;;  %v915_v43 = vpop.f32.mrb[3].mxu1 }
 0x152   :  { %v1825_v30 = vrot.slane %v1817_v22, 4  ;;  %v2309_v11 = vadd.f32 %v1690_v29, %v915_v43 }
 0x153   :  { %v2288_v37 = vpop.f32.mrb[4].mxu0 }
 0x154   :  { %v1703_v41 = vpop.f32.mrb[5].mxu0  ;;  %v1826_v44 = vmax.f32 %v1817_v22, %v1825_v30  ;;  %v1873_v4 = vmax.f32 %v2307_v33, %v2309_v11 }
 0x155   :  { %v2289_v26 = vpop.f32.mrb[6].mxu0 }
 0x156   :  { %v1706_v5 = vpop.f32.mrb[7].mxu0  ;;  %v1827_v21 = vrot.slane %v1826_v44, 2  ;;  %v1874_v14 = vrot.slane %v1873_v4, 4  ;;  %v2232_v57 = vpop.f32.mrb[4].mxu1 }
 0x157   :  { %v2310_v46 = vadd.f32 %v2288_v37, %v2232_v57  ;;  %v928_v62 = vpop.f32.mrb[5].mxu1 }
 0x158   :  { %v1828_v15 = vmax.f32 %v1826_v44, %v1827_v21  ;;  %v1875_v47 = vmax.f32 %v1873_v4, %v1874_v14  ;;  %v2311_v48 = vadd.f32 %v1703_v41, %v928_v62  ;;  %v2233_v60 = vpop.f32.mrb[6].mxu1 }
 0x159   :  { %v2312_v52 = vadd.f32 %v2289_v26, %v2233_v60  ;;  %v931_v12 = vpop.f32.mrb[7].mxu1 }
 0x15a   :  { %v1876_v13 = vrot.slane %v1875_v47, 2  ;;  %v1880_v49 = vmax.f32 %v2308_v34, %v2311_v48  ;;  %v2313_v23 = vadd.f32 %v1706_v5, %v931_v12  ;;  %v1829_v24 = vrot.slane %v1828_v15, 1 }
 0x15b   :  { %v1887_v38 = vmax.f32 %v2310_v46, %v2312_v52 }
 0x15c   :  { %v1877_v39 = vmax.f32 %v1875_v47, %v1876_v13  ;;  %v1881_v8 = vrot.slane %v1880_v49, 4  ;;  %v1818_v1 = vsel %vm3039_vm11, %v2313_v23, -3.4028235e+38  ;;  %v1830_v20 = vmax.f32 %v1828_v15, %v1829_v24 }
 0x15d   :  { %v1888_v50 = vrot.slane %v1887_v38, 4  ;;  %v1831_v16 = vrot.slane %v1818_v1, 4 }
 0x15e   :  { %v2292_v9 = vpop.f32.mrb[8].mxu0  ;;  %v1878_v53 = vrot.slane %v1877_v39, 1  ;;  %v1882_v51 = vmax.f32 %v1880_v49, %v1881_v8 }
 0x15f   :  { %v1719_v59 = vpop.f32.mrb[9].mxu0  ;;  %v2236_v56 = vpop.f32.mrb[8].mxu1  ;;  %v1889_v36 = vmax.f32 %v1887_v38, %v1888_v50  ;;  %v1832_v25 = vmax.f32 %v1818_v1, %v1831_v16 }
 0x160   :  { %v2293_v31 = vpop.f32.mrb[10].mxu0  ;;  %v2314_v2 = vadd.f32 %v2292_v9, %v2236_v56  ;;  %v944_v18 = vpop.f32.mrb[9].mxu1  ;;  %v1879_v28 = vmax.f32 %v1877_v39, %v1878_v53  ;;  %v1883_v35 = vrot.slane %v1882_v51, 2 }
 0x161   :  { %v1722_v10 = vpop.f32.mrb[11].mxu0  ;;  %v2315_v54 = vadd.f32 %v1719_v59, %v944_v18  ;;  %v2237_v32 = vpop.f32.mrb[10].mxu1  ;;  %v1890_v45 = vrot.slane %v1889_v36, 2  ;;  %v1833_v7 = vrot.slane %v1832_v25, 2 }
 0x162   :  { %v2316_v58 = vadd.f32 %v2293_v31, %v2237_v32  ;;  %v947_v3 = vpop.f32.mrb[11].mxu1  ;;  %v1929_v63 = vmax.f32 %v1830_v20, %v1879_v28  ;;  %v1884_v42 = vmax.f32 %v1882_v51, %v1883_v35 }
 0x163   :  { %v1819_v55 = vsel %vm3039_vm11, %v2315_v54, -3.4028235e+38  ;;  %v2317_v27 = vadd.f32 %v1722_v10, %v947_v3  ;;  %v1834_v29 = vmax.f32 %v1832_v25, %v1833_v7  ;;  %v1891_v0 = vmax.f32 %v1889_v36, %v1890_v45 }
 0x164   :  { %v1837_v19 = vrot.slane %v1819_v55, 4  ;;  %v1820_v6 = vsel %vm3039_vm11, %v2316_v58, -3.4028235e+38  ;;  %v1885_v40 = vrot.slane %v1884_v42, 1  ;;  %v1937_v48 = vmax.f32 %v1929_v63, 0.0 }
 0x165   :  { %v1843_v33 = vrot.slane %v1820_v6, 4  ;;  %v1894_v17 = vmax.f32 %v2317_v27, %v2314_v2  ;;  %v1835_v22 = vrot.slane %v1834_v29, 1  ;;  %v1892_v44 = vrot.slane %v1891_v0, 1 }
 0x166   :  { %v1838_v34 = vmax.f32 %v1819_v55, %v1837_v19  ;;  %v1886_v43 = vmax.f32 %v1884_v42, %v1885_v40 }
 0x167   :  { %v1844_v30 = vmax.f32 %v1820_v6, %v1843_v33  ;;  %v1895_v37 = vrot.slane %v1894_v17, 4  ;;  %v1836_v11 = vmax.f32 %v1834_v29, %v1835_v22  ;;  %v1893_v23 = vmax.f32 %v1891_v0, %v1892_v44 }
 0x168   :  { %v1839_v41 = vrot.slane %v1838_v34, 2 }
 0x169   :  { %v1845_v26 = vrot.slane %v1844_v30, 2  ;;  %v1896_v5 = vmax.f32 %v1894_v17, %v1895_v37  ;;  %v1930_v21 = vmax.f32 %v1836_v11, %v1886_v43 }
 0x16a   :  { %v2296_v4 = vpop.f32.mrb[12].mxu0  ;;  %v1840_v14 = vmax.f32 %v1838_v34, %v1839_v41 }
 0x16b   :  { %v1735_v57 = vpop.f32.mrb[13].mxu0  ;;  %v1846_v46 = vmax.f32 %v1844_v30, %v1845_v26  ;;  %v1897_v62 = vrot.slane %v1896_v5, 2  ;;  %v2240_v47 = vpop.f32.mrb[12].mxu1  ;;  %v1938_v60 = vmax.f32 %v1930_v21, 0.0 }
 0x16c   :  { %v2297_v15 = vpop.f32.mrb[14].mxu0  ;;  %v1841_v52 = vrot.slane %v1840_v14, 1  ;;  %v2318_v13 = vadd.f32 %v2296_v4, %v2240_v47  ;;  %v960_v49 = vpop.f32.mrb[13].mxu1 }
 0x16d   :  { %v1738_v12 = vpop.f32.mrb[15].mxu0  ;;  %v1847_v38 = vrot.slane %v1846_v46, 1  ;;  %v1898_v24 = vmax.f32 %v1896_v5, %v1897_v62  ;;  %v2319_v39 = vadd.f32 %v1735_v57, %v960_v49  ;;  %v2241_v8 = vpop.f32.mrb[14].mxu1  ;;  %v1954_v1 = vsel %vm1953_vm12, %v1938_v60, %v1937_v48 }
 0x16e   :  { %v1842_v9 = vmax.f32 %v1840_v14, %v1841_v52  ;;  %v1821_v50 = vsel %vm3039_vm11, %v2318_v13, -3.4028235e+38  ;;  %v2320_v16 = vadd.f32 %v2297_v15, %v2241_v8  ;;  %v963_v53 = vpop.f32.mrb[15].mxu1 }
 0x16f   :  { %v1899_v51 = vrot.slane %v1898_v24, 1  ;;  %v1849_v59 = vrot.slane %v1821_v50, 4  ;;  %v2321_v56 = vadd.f32 %v1738_v12, %v963_v53  ;;  %v1848_v25 = vmax.f32 %v1846_v46, %v1847_v38 }
 0x170   :  { %v1931_v36 = vmax.f32 %v1842_v9, %v1893_v23 }
 0x171   :  { %v1900_v31 = vmax.f32 %v1898_v24, %v1899_v51  ;;  %v1850_v2 = vmax.f32 %v1821_v50, %v1849_v59  ;;  %v1901_v18 = vmax.f32 %v2319_v39, %v2321_v56 }
 0x172   :  { %v1939_v20 = vmax.f32 %v1931_v36, 0.0 }
 0x173   :  { %v1932_v28 = vmax.f32 %v1848_v25, %v1900_v31  ;;  %v1851_v35 = vrot.slane %v1850_v2, 2  ;;  %v1902_v10 = vrot.slane %v1901_v18, 4 }
 0x174   :  { %v1956_v54 = vsel %vm1955_vm13, %v1939_v20, %v1954_v1 }
 0x175   :  { %v1940_v32 = vmax.f32 %v1932_v28, 0.0  ;;  %v1852_v45 = vmax.f32 %v1850_v2, %v1851_v35  ;;  %v1903_v7 = vmax.f32 %v1901_v18, %v1902_v10 }
 0x176   :  { %v2300_v58 = vpop.f32.mrb[16].mxu0 }
 0x177   :  { %v1751_v3 = vpop.f32.mrb[17].mxu0  ;;  %v1904_v63 = vrot.slane %v1903_v7, 2  ;;  %v2244_v42 = vpop.f32.mrb[16].mxu1  ;;  %v1958_v55 = vsel %vm1957_vm14, %v1940_v32, %v1956_v54  ;;  %v1853_v6 = vrot.slane %v1852_v45, 1 }
 0x178   :  { %v2301_v27 = vpop.f32.mrb[18].mxu0  ;;  %v2322_v29 = vadd.f32 %v2300_v58, %v2244_v42  ;;  %v976_v19 = vpop.f32.mrb[17].mxu1 }
 0x179   :  { %v1905_v40 = vmax.f32 %v1903_v7, %v1904_v63  ;;  %v1754_v0 = vpop.f32.mrb[19].mxu0  ;;  %v2323_v33 = vadd.f32 %v1751_v3, %v976_v19  ;;  %v2245_v17 = vpop.f32.mrb[18].mxu1  ;;  %v1854_v41 = vmax.f32 %v1852_v45, %v1853_v6 }
 0x17a   :  { %v2324_v22 = vadd.f32 %v2301_v27, %v2245_v17  ;;  %v979_v34 = vpop.f32.mrb[19].mxu1 }
 0x17b   :  { %v1906_v43 = vrot.slane %v1905_v40, 1  ;;  %v1908_v30 = vmax.f32 %v2320_v16, %v2323_v33  ;;  %v2325_v37 = vadd.f32 %v1754_v0, %v979_v34 }
 0x17c   :  { %v1915_v11 = vmax.f32 %v2322_v29, %v2324_v22 }
 0x17d   :  { %v1907_v44 = vmax.f32 %v1905_v40, %v1906_v43  ;;  %v1909_v4 = vrot.slane %v1908_v30, 4  ;;  %v1822_v26 = vsel %vm3039_vm11, %v2325_v37, -3.4028235e+38 }
 0x17e   :  { %v1916_v5 = vrot.slane %v1915_v11, 4  ;;  %v1855_v21 = vrot.slane %v1822_v26, 4 }
 0x17f   :  { %v1933_v14 = vmax.f32 %v1854_v41, %v1907_v44  ;;  %v1910_v57 = vmax.f32 %v1908_v30, %v1909_v4 }
 0x180   :  { %v1856_v46 = vmax.f32 %v1822_v26, %v1855_v21  ;;  %v1917_v48 = vmax.f32 %v1915_v11, %v1916_v5 }
 0x181   :  { %v1941_v62 = vmax.f32 %v1933_v14, 0.0  ;;  %v1911_v15 = vrot.slane %v1910_v57, 2  ;;  %v2304_v47 = vpop.f32.mrb[20].mxu0 }
 0x182   :  { %v1767_v60 = vpop.f32.mrb[21].mxu0  ;;  %v1857_v52 = vrot.slane %v1856_v46, 2  ;;  %v2248_v12 = vpop.f32.mrb[20].mxu1  ;;  %v1918_v16 = vrot.slane %v1917_v48, 2 }
 0x183   :  { %v1912_v13 = vmax.f32 %v1910_v57, %v1911_v15  ;;  %v2305_v49 = vpop.f32.mrb[22].mxu0  ;;  %v2326_v23 = vadd.f32 %v2304_v47, %v2248_v12  ;;  %v992_v38 = vpop.f32.mrb[21].mxu1  ;;  %v1960_v24 = vsel %vm230_vm2, %v1941_v62, %v1958_v55 }
 0x184   :  { %v1858_v39 = vmax.f32 %v1856_v46, %v1857_v52  ;;  %v1770_v8 = vpop.f32.mrb[23].mxu0  ;;  %v2327_v1 = vadd.f32 %v1767_v60, %v992_v38  ;;  %v2249_v9 = vpop.f32.mrb[22].mxu1  ;;  %v1919_v35 = vmax.f32 %v1917_v48, %v1918_v16 }
 0x185   :  { %v1913_v50 = vrot.slane %v1912_v13, 1  ;;  %v2328_v53 = vadd.f32 %v2305_v49, %v2249_v9  ;;  %v995_v51 = vpop.f32.mrb[23].mxu1 }
 0x186   :  { %v1859_v59 = vrot.slane %v1858_v39, 1  ;;  %v1823_v56 = vsel %vm3039_vm11, %v2327_v1, -3.4028235e+38  ;;  %v2329_v36 = vadd.f32 %v1770_v8, %v995_v51  ;;  %v1920_v42 = vrot.slane %v1919_v35, 1 }
 0x187   :  { %v1914_v25 = vmax.f32 %v1912_v13, %v1913_v50  ;;  %v1861_v31 = vrot.slane %v1823_v56, 4  ;;  %v1824_v2 = vsel %vm3039_vm11, %v2328_v53, -3.4028235e+38 }
 0x188   :  { %v1860_v18 = vmax.f32 %v1858_v39, %v1859_v59  ;;  %v1867_v20 = vrot.slane %v1824_v2, 4  ;;  %v1922_v28 = vmax.f32 %v2329_v36, %v2326_v23  ;;  %v1921_v0 = vmax.f32 %v1919_v35, %v1920_v42 }
 0x189   :  { %v1862_v10 = vmax.f32 %v1823_v56, %v1861_v31 }
 0x18a   :  { %v1934_v54 = vmax.f32 %v1860_v18, %v1914_v25  ;;  %v1868_v32 = vmax.f32 %v1824_v2, %v1867_v20  ;;  %v1923_v45 = vrot.slane %v1922_v28, 4 }
 0x18b   :  { %v1863_v7 = vrot.slane %v1862_v10, 2 }
 0x18c   :  { %v1942_v58 = vmax.f32 %v1934_v54, 0.0  ;;  %v1869_v3 = vrot.slane %v1868_v32, 2  ;;  %v1924_v63 = vmax.f32 %v1922_v28, %v1923_v45 }
 0x18d   :  { %v1864_v55 = vmax.f32 %v1862_v10, %v1863_v7 }
 0x18e   :  { %v1870_v27 = vmax.f32 %v1868_v32, %v1869_v3  ;;  %v1925_v29 = vrot.slane %v1924_v63, 2  ;;  %v1962_v19 = vsel %vm1961_vm15, %v1942_v58, %v1960_v24 }
 0x18f   :  { %v1865_v61 = vrot.slane %v1864_v55, 1 }
 0x190   :  { %v1871_v6 = vrot.slane %v1870_v27, 1  ;;  %v1926_v40 = vmax.f32 %v1924_v63, %v1925_v29 }
 0x191   :  { %v1866_v33 = vmax.f32 %v1864_v55, %v1865_v61 }
 0x192   :  { %v1927_v17 = vrot.slane %v1926_v40, 1  ;;  %v1872_v34 = vmax.f32 %v1870_v27, %v1871_v6 }
 0x193   :  { %v1935_v22 = vmax.f32 %v1866_v33, %v1921_v0 }
 0x194   :  { %v1928_v43 = vmax.f32 %v1926_v40, %v1927_v17 }
 0x195   :  { %v1943_v30 = vmax.f32 %v1935_v22, 0.0 }
 0x196   :  { %v1936_v37 = vmax.f32 %v1872_v34, %v1928_v43 }
 0x197   :  { %v1964_v11 = vsel %vm1963_vm0, %v1943_v30, %v1962_v19 }
 0x198   :  { %v1944_v41 = vmax.f32 %v1936_v37, 0.0 }
 0x19a   :  { %v1966_v44 = vsel %vm1965_vm1, %v1944_v41, %v1964_v11 }
 0x19b   :  { %1968 = vst [vmem:[#allocation8] sm:$0xff] %v1966_v44 }
 0x19c   :  { %2461 = shalt.err (!%p2458_p6)
}
 0x19d   :  { %s2462_s17 = scalar_lea.hbm %s3076_s3, 128 }
 0x19e   :  { %p2463_p7 = scmp.ne.s32.totalorder %s3076_s3, %s2462_s17  ;;  %p2466_p8 = scmp.lt.u32.totalorder %s2462_s17, %s3076_s3 }
 0x1a0   :  { %p2468_p9 = pnand %p2466_p8, %p2463_p7 }
 0x1a2   :  { %2471 = shalt.err (!%p2468_p9)
}
 0x1a3   :  { %1978 = dma.vmem_to_hbm [thread:$0]  %s1976_s13, 128, %s3076_s3, [#allocation5]  }
 0x1a4   :  { %2476 = dma.done.wait [#allocation5], 128  }
 0x1a5   :  { %2477 = vsyncadd [#allocation5], 4294967168 }
 0x1a6   :  { %1982 = vsyncpa [#allocation4], 1 }
 0x1a7   :  { %1983 = vsyncpa [#allocation7], 1 }
 0x1a8   :  { %1984 = vsyncpa [#allocation5], 1 }

</bundles_post_ra>
